<compile_context>
chip_gen: v5e
topology: v5e:2x2
jax: 0.10.0
libtpu: 0.0.40
codegen_flags: <defaults>
</compile_context>

<pallas_src>
import math
from functools import partial

import jax
import jax.numpy as jnp
from jax.experimental import pallas as pl
from jax.experimental.pallas import tpu as pltpu


def _round_up(x, m):
    return ((x + m - 1) // m) * m


def _pad2(m, rows, cols):
    return jnp.pad(m, ((0, rows - m.shape[0]), (0, cols - m.shape[1])))


# ----------------------------- Pallas kernel --------------------------------

def _make_sage_kernel(*, din_p, tm, tk, final):
    """One SAGEConv layer (+ReLU[, +regression head]). grid = (row tiles, A-column tiles)."""

    def kernel(a_ref, x_ref, dinv_ref, w_ref, b_ref, *rest):
        if final:
            rw_ref, rb_ref, o_ref, acc_ref = rest
        else:
            o_ref, acc_ref = rest

        i = pl.program_id(0)            # row tile (destination nodes)
        k = pl.program_id(1)            # reduction tile over A columns (source nodes)

        @pl.when(k == 0)
        def _init():
            # Left half: aggregation accumulator. Right half: root features (staged once),
            # so the finalize is a single wide (K = 2*din_p) matmul with [Wl ; Wr].
            acc_ref[:, :din_p] = jnp.zeros((tm, din_p), jnp.float32)
            r0 = pl.multiple_of(i * tm, tm)
            acc_ref[:, din_p:] = x_ref[pl.ds(r0, tm), :].astype(jnp.float32)

        # Unnormalized neighbor sum: int8 {0,1} adjacency tile -> bf16 -> MXU, f32 accumulate.
        c0 = pl.multiple_of(k * tk, tk)
        a_bf = a_ref[...].astype(jnp.float32).astype(jnp.bfloat16)
        acc_ref[:, :din_p] += jnp.dot(
            a_bf, x_ref[pl.ds(c0, tk), :], preferred_element_type=jnp.float32)

        @pl.when(k == pl.num_programs(1) - 1)
        def _finalize():
            # Exact f32 1/in_degree scaling (mean aggregation) applied once per row tile.
            acc_ref[:, :din_p] = acc_ref[:, :din_p] * dinv_ref[...]
            feat = acc_ref[...].astype(jnp.bfloat16)            # [mean_agg | x_root]
            h = jnp.dot(feat, w_ref[...], preferred_element_type=jnp.float32)
            h = jnp.maximum(h + b_ref[...], 0.0)                # bias only on lin_l; ReLU
            if final:
                # Regression head fused in: weight lives in lane 0 of a 128-wide block so the
                # output store is lane-dense (no masked vst); host slices [:, :1].
                out = jnp.dot(h, rw_ref[...], preferred_element_type=jnp.float32)
                o_ref[...] = out + rb_ref[...]
            else:
                o_ref[...] = h.astype(o_ref.dtype)

    return kernel


# --------------------------- pallas_call builder -----------------------------

def _sage_layer_call(a_i8, x_bf16, dinv, w_cat, b, *, tm, tk, reg_w=None, reg_b=None):
    """One SAGEConv layer as a single gridded pallas_call (regression head fused if given)."""
    n_pad = a_i8.shape[0]
    din_p = x_bf16.shape[1]
    dh_p = w_cat.shape[1]
    final = reg_w is not None
    grid = (n_pad // tm, n_pad // tk)

    kernel = _make_sage_kernel(din_p=din_p, tm=tm, tk=tk, final=final)

    in_specs = [
        pl.BlockSpec((tm, tk), lambda i, k: (i, k)),            # A tile (int8 counts)
        pl.BlockSpec((n_pad, din_p), lambda i, k: (0, 0)),      # x, VMEM-resident (fetched once)
        pl.BlockSpec((tm, 1), lambda i, k: (i, 0)),             # 1/in_degree (f32)
        pl.BlockSpec((2 * din_p, dh_p), lambda i, k: (0, 0)),   # [Wl ; Wr] (bf16)
        pl.BlockSpec((1, dh_p), lambda i, k: (0, 0)),           # bias (lin_l only, f32)
    ]
    operands = [a_i8, x_bf16, dinv, w_cat, b]

    flops = 2 * n_pad * n_pad * din_p + 2 * n_pad * (2 * din_p) * dh_p
    bytes_accessed = (n_pad * n_pad                 # int8 adjacency (streamed once)
                      + n_pad * din_p * 2           # resident x (fetched once)
                      + n_pad * 4                   # deg_inv
                      + 2 * din_p * dh_p * 2        # fused weights
                      + dh_p * 4)                   # bias

    if final:
        in_specs += [
            pl.BlockSpec((dh_p, 128), lambda i, k: (0, 0)),     # regression weight (lane 0)
            pl.BlockSpec((1, 128), lambda i, k: (0, 0)),        # regression bias (lane 0)
        ]
        operands += [reg_w, reg_b]
        out_shape = jax.ShapeDtypeStruct((n_pad, 128), jnp.float32)   # lane-dense store
        out_spec = pl.BlockSpec((tm, 128), lambda i, k: (i, 0))
        flops += 2 * n_pad * dh_p * 128
        bytes_accessed += dh_p * 128 * 4 + 128 * 4 + n_pad * 128 * 4
    else:
        out_shape = jax.ShapeDtypeStruct((n_pad, dh_p), jnp.bfloat16)
        out_spec = pl.BlockSpec((tm, dh_p), lambda i, k: (i, 0))
        bytes_accessed += n_pad * dh_p * 2

    # VMEM budget: double-buffered tiles + resident x (2 bufs) + f32 scratch accumulator.
    vmem_bytes = (2 * tm * tk                       # A tiles (int8)
                  + 2 * n_pad * din_p * 2           # resident x
                  + 2 * tm * 128 * 4                # deg_inv block (lane-padded)
                  + 2 * 2 * din_p * dh_p * 2        # weights
                  + 2 * 8 * dh_p * 4                # bias (sublane-padded)
                  + tm * 2 * din_p * 4)             # scratch accumulator
    if final:
        vmem_bytes += 2 * (dh_p * 128 * 4 + 8 * 128 * 4 + tm * 128 * 4)
    else:
        vmem_bytes += 2 * tm * dh_p * 2
    # Raise the scoped-VMEM limit with headroom; cap at v7x's 64 MiB physical VMEM.
    vmem_limit = int(min(max(2 * vmem_bytes, 32 << 20), 64 << 20))

    return pl.pallas_call(
        kernel,
        out_shape=out_shape,
        grid=grid,
        in_specs=in_specs,
        out_specs=out_spec,
        scratch_shapes=[pltpu.VMEM((tm, 2 * din_p), jnp.float32)],
        compiler_params=pltpu.CompilerParams(
            dimension_semantics=("parallel", "arbitrary"),
            vmem_limit_bytes=vmem_limit),
        cost_estimate=pl.CostEstimate(
            flops=int(flops), transcendentals=0,
            bytes_accessed=int(bytes_accessed)),
    )(*operands)


# ------------------------------ model wrapper -------------------------------

def init_sage_params(key, input_dim, hidden_dim, layer_num=2):
    """Deterministic parameter init mirroring the module's shapes (weights pre-transposed)."""
    params = {"convs": []}
    dims = [input_dim] + [hidden_dim] * layer_num
    for i in range(layer_num):
        din, dout = dims[i], dims[i + 1]
        key, k1, k2, k3 = jax.random.split(key, 4)
        scale = 1.0 / jnp.sqrt(jnp.float32(din))
        params["convs"].append({
            "wl": jax.random.normal(k1, (din, dout), jnp.float32) * scale,
            "bl": jax.random.normal(k2, (1, dout), jnp.float32) * scale,
            "wr": jax.random.normal(k3, (din, dout), jnp.float32) * scale,
        })
    key, k1, k2 = jax.random.split(key, 3)
    scale = 1.0 / jnp.sqrt(jnp.float32(hidden_dim))
    params["reg_w"] = jax.random.normal(k1, (hidden_dim, 1), jnp.float32) * scale
    params["reg_b"] = jax.random.normal(k2, (1, 1), jnp.float32) * scale
    return params


def build_adjacency(edge_index, num_nodes):
    """Dense edge-count matrix A[dst, src] (small ints) and f32 1/in_degree column vector."""
    src, dst = edge_index[0], edge_index[1]
    counts = jnp.zeros((num_nodes, num_nodes), jnp.float32).at[dst, src].add(1.0)
    deg = counts.sum(axis=1, keepdims=True)
    dinv = jnp.where(deg > 0, 1.0 / jnp.maximum(deg, 1.0), 0.0)
    return counts, dinv


def _pick_tiles(n):
    """Tiles that divide the 128-padded node count: tk>=256 when possible (fills the v6e/v7x
    256-deep MXU), >=2 row tiles when possible (v7x megacore), no lcm padding blow-up."""
    n_pad = _round_up(n, 128)
    tk = next(t for t in (512, 256, 128) if n_pad % t == 0)
    tm_opts = [t for t in (512, 256, 128) if n_pad % t == 0]
    tm = next((t for t in tm_opts if n_pad // t >= 2), tm_opts[-1])
    return tm, tk, n_pad


@jax.jit
def sage_forward(params, x, edge_index):
    n, _ = x.shape
    tm, tk, n_pad = _pick_tiles(n)

    # 1-byte {0,1,..} adjacency stream (edge counts <= 127 assumed); the exact f32 row scale
    # 1/in_degree is applied inside the kernel epilogue instead of being baked into bf16 A.
    counts, dinv = build_adjacency(edge_index, n)
    a = _pad2(counts, n_pad, n_pad).astype(jnp.int8)
    dinv = jnp.pad(dinv, ((0, n_pad - n), (0, 0)))

    convs = params["convs"]
    din0 = convs[0]["wl"].shape[0]
    h = _pad2(x, n_pad, _round_up(din0, 128)).astype(jnp.bfloat16)

    n_layers = len(convs)
    for li, conv in enumerate(convs):
        wl, bl, wr = conv["wl"], conv["bl"], conv["wr"]
        din, dh = wl.shape
        din_p, dh_p = _round_up(din, 128), _round_up(dh, 128)

        # Host-side fusion: stack [Wl ; Wr] on the (padded) input axis -> one K=2*din_p MXU pass.
        w_cat = jnp.zeros((2 * din_p, dh_p), jnp.float32)
        w_cat = w_cat.at[:din, :dh].set(wl)
        w_cat = w_cat.at[din_p:din_p + din, :dh].set(wr)
        w_cat = w_cat.astype(jnp.bfloat16)
        b = _pad2(bl, 1, dh_p)

        if li == n_layers - 1:
            # Regression head packed lane-dense: real weight/bias in lane 0, zeros elsewhere.
            rw = jnp.zeros((dh_p, 128), jnp.float32).at[:dh, 0].set(params["reg_w"][:, 0])
            rb = jnp.zeros((1, 128), jnp.float32).at[0, 0].set(params["reg_b"][0, 0])
            h = _sage_layer_call(a, h, dinv, w_cat, b, tm=tm, tk=tk, reg_w=rw, reg_b=rb)
        else:
            h = _sage_layer_call(a, h, dinv, w_cat, b, tm=tm, tk=tk)
        # F.dropout(p=0.5, training=False) -> identity (eval mode).
        # NOTE: padded node rows carry relu(bias) != 0 in intermediate layers; this is
        # harmless because padded A columns are zero (no edges into padding) and the final
        # [:n] slice drops those rows.

    # Final kernel wrote a lane-dense (n_pad, 128) block; the per-node prediction is lane 0.
    return h[:n, :1]


def sage_reference(params, x, edge_index):
    """Pure-JAX f32 reference of the module's forward pass."""
    n = x.shape[0]
    counts, dinv = build_adjacency(edge_index, n)
    a = counts * dinv
    h = x
    for conv in params["convs"]:
        h = jnp.maximum((a @ h) @ conv["wl"] + conv["bl"] + h @ conv["wr"], 0.0)
    return h @ params["reg_w"] + params["reg_b"]


# ---------------------------------- main -------------------------------------

if __name__ == "__main__":
    key = jax.random.PRNGKey(0)

    num_nodes = 200
    input_dim = 48
    hidden_dim = 96
    layer_num = 2

    key, kx, kp = jax.random.split(key, 3)
    x = jax.random.normal(kx, (num_nodes, input_dim), jnp.float32)

    # Deterministic graph: directed ring plus chords (edges src -> dst).
    ring_src = jnp.arange(num_nodes, dtype=jnp.int32)
    ring_dst = (ring_src + 1) % num_nodes
    chord_src = jnp.arange(0, num_nodes, 7, dtype=jnp.int32)
    chord_dst = (chord_src * 3 + 5) % num_nodes
    edge_index = jnp.stack([jnp.concatenate([ring_src, chord_src]),
                            jnp.concatenate([ring_dst, chord_dst])], axis=0)

    params = init_sage_params(kp, input_dim, hidden_dim, layer_num)

    out = sage_forward(params, x, edge_index)
    out = jax.block_until_ready(out)

    assert out.shape == (num_nodes, 1), out.shape
    assert bool(jnp.all(jnp.isfinite(out)))

    # Numerical check against the f32 reference (bf16 activations in-kernel -> loose tol).
    ref = sage_reference(params, x, edge_index)
    rel_err = float(jnp.linalg.norm(out - ref) / (jnp.linalg.norm(ref) + 1e-6))
    assert rel_err < 5e-2, f"relative error too large: {rel_err}"

    print("KERNEL_OK")
</pallas_src>

<mosaic_0001>
module attributes {stable_mosaic.version = 11 : i64} {
  func.func @kernel(%arg0: i32, %arg1: i32, %arg2: memref<128x256xi8, #tpu.memory_space<vmem>>, %arg3: memref<256x128xbf16, #tpu.memory_space<vmem>>, %arg4: memref<128x1xf32, #tpu.memory_space<vmem>>, %arg5: memref<256x128xbf16, #tpu.memory_space<vmem>>, %arg6: memref<1x128xf32, #tpu.memory_space<vmem>>, %arg7: memref<128x128xbf16, #tpu.memory_space<vmem>>, %arg8: memref<128x256xf32, #tpu.memory_space<vmem>>) attributes {dimension_semantics = [#tpu.dimension_semantics<parallel>, #tpu.dimension_semantics<arbitrary>], iteration_bounds = array<i64: 2, 1>, scalar_prefetch = 0 : i64, scratch_operands = 1 : i64, tpu.core_type = #tpu.core_type<tc>, window_params = [{transform_indices = @transform_0, window_bounds = array<i64: 128, 256>}, {pipeline_mode = #tpu.pipeline_mode<synchronous>, transform_indices = @transform_1, window_bounds = array<i64: 256, 128>}, {transform_indices = @transform_2, window_bounds = array<i64: 128, 1>}, {pipeline_mode = #tpu.pipeline_mode<synchronous>, transform_indices = @transform_3, window_bounds = array<i64: 256, 128>}, {pipeline_mode = #tpu.pipeline_mode<synchronous>, transform_indices = @transform_4, window_bounds = array<i64: 1, 128>}, {transform_indices = @transform_5, window_bounds = array<i64: 128, 128>}]} {
    %c0_i32 = arith.constant 0 : i32
    %0 = arith.cmpi eq, %arg1, %c0_i32 : i32
    %1 = arith.extui %0 : i1 to i32
    %c0_i32_0 = arith.constant 0 : i32
    %2 = arith.cmpi ne, %1, %c0_i32_0 : i32
    scf.if %2 {
      %cst_9 = arith.constant 0.000000e+00 : f32
      %17 = vector.broadcast %cst_9 : f32 to vector<128x128xf32>
      %c0_10 = arith.constant 0 : index
      %c0_11 = arith.constant 0 : index
      %18 = vector.load %arg8[%c0_10, %c0_11] : memref<128x256xf32, #tpu.memory_space<vmem>>, vector<128x128xf32>
      tpu.vector_store %arg8[%c0_10, %c0_11], %17 {strides = array<i32>} : memref<128x256xf32, #tpu.memory_space<vmem>>, vector<128x128xf32>,
      %c128_i32 = arith.constant 128 : i32
      %19 = arith.muli %arg0, %c128_i32 : i32
      %20 = tpu.assume_multiple %19, 128 : i32
      %21 = arith.index_cast %20 : i32 to index
      %c0_12 = arith.constant 0 : index
      %22 = vector.load %arg3[%21, %c0_12] : memref<256x128xbf16, #tpu.memory_space<vmem>>, vector<128x128xbf16>
      %23 = arith.extf %22 : vector<128x128xbf16> to vector<128x128xf32>
      %c0_13 = arith.constant 0 : index
      %c128 = arith.constant 128 : index
      %24 = vector.load %arg8[%c0_13, %c128] : memref<128x256xf32, #tpu.memory_space<vmem>>, vector<128x128xf32>
      tpu.vector_store %arg8[%c0_13, %c128], %23 {strides = array<i32>} : memref<128x256xf32, #tpu.memory_space<vmem>>, vector<128x128xf32>,
    } else {
    }
    %c256_i32 = arith.constant 256 : i32
    %3 = arith.muli %arg1, %c256_i32 : i32
    %4 = tpu.assume_multiple %3, 256 : i32
    %c0 = arith.constant 0 : index
    %c0_1 = arith.constant 0 : index
    %5 = vector.load %arg2[%c0, %c0_1] : memref<128x256xi8, #tpu.memory_space<vmem>>, vector<128x256xi8>
    %6 = arith.sitofp %5 : vector<128x256xi8> to vector<128x256xf32>
    %7 = arith.truncf %6 : vector<128x256xf32> to vector<128x256xbf16>
    %c0_2 = arith.constant 0 : index
    %c0_3 = arith.constant 0 : index
    %8 = vector.load %arg8[%c0_2, %c0_3] : memref<128x256xf32, #tpu.memory_space<vmem>>, vector<128x128xf32>
    %9 = arith.index_cast %4 : i32 to index
    %c0_4 = arith.constant 0 : index
    %10 = vector.load %arg3[%9, %c0_4] : memref<256x128xbf16, #tpu.memory_space<vmem>>, vector<256x128xbf16>
    %cst = arith.constant dense<0.000000e+00> : vector<128x128xf32>
    %11 = tpu.matmul %7, %10, %cst {dimension_numbers = #tpu.dot_dimension_numbers<[1], [0], [0], [1], [0, 0, 1, 1], [], []>} : vector<128x256xbf16>, vector<256x128xbf16>, vector<128x128xf32> -> vector<128x128xf32>
    %12 = arith.addf %8, %11 : vector<128x128xf32>
    %c0_5 = arith.constant 0 : index
    %c0_6 = arith.constant 0 : index
    %13 = vector.load %arg8[%c0_5, %c0_6] : memref<128x256xf32, #tpu.memory_space<vmem>>, vector<128x128xf32>
    tpu.vector_store %arg8[%c0_5, %c0_6], %12 {strides = array<i32>} : memref<128x256xf32, #tpu.memory_space<vmem>>, vector<128x128xf32>,
    %c0_i32_7 = arith.constant 0 : i32
    %14 = arith.cmpi eq, %arg1, %c0_i32_7 : i32
    %15 = arith.extui %14 : i1 to i32
    %c0_i32_8 = arith.constant 0 : i32
    %16 = arith.cmpi ne, %15, %c0_i32_8 : i32
    scf.if %16 {
      %c0_9 = arith.constant 0 : index
      %c0_10 = arith.constant 0 : index
      %17 = vector.load %arg8[%c0_9, %c0_10] : memref<128x256xf32, #tpu.memory_space<vmem>>, vector<128x128xf32>
      %c0_11 = arith.constant 0 : index
      %c0_12 = arith.constant 0 : index
      %18 = vector.load %arg4[%c0_11, %c0_12] : memref<128x1xf32, #tpu.memory_space<vmem>>, vector<128x1xf32>
      %19 = vector.broadcast %18 : vector<128x1xf32> to vector<128x128xf32>
      %20 = arith.mulf %17, %19 : vector<128x128xf32>
      %c0_13 = arith.constant 0 : index
      %c0_14 = arith.constant 0 : index
      %21 = vector.load %arg8[%c0_13, %c0_14] : memref<128x256xf32, #tpu.memory_space<vmem>>, vector<128x128xf32>
      tpu.vector_store %arg8[%c0_13, %c0_14], %20 {strides = array<i32>} : memref<128x256xf32, #tpu.memory_space<vmem>>, vector<128x128xf32>,
      %c0_15 = arith.constant 0 : index
      %c0_16 = arith.constant 0 : index
      %22 = vector.load %arg8[%c0_15, %c0_16] : memref<128x256xf32, #tpu.memory_space<vmem>>, vector<128x256xf32>
      %23 = arith.truncf %22 : vector<128x256xf32> to vector<128x256xbf16>
      %c0_17 = arith.constant 0 : index
      %c0_18 = arith.constant 0 : index
      %24 = vector.load %arg5[%c0_17, %c0_18] : memref<256x128xbf16, #tpu.memory_space<vmem>>, vector<256x128xbf16>
      %cst_19 = arith.constant dense<0.000000e+00> : vector<128x128xf32>
      %25 = tpu.matmul %23, %24, %cst_19 {dimension_numbers = #tpu.dot_dimension_numbers<[1], [0], [0], [1], [0, 0, 1, 1], [], []>} : vector<128x256xbf16>, vector<256x128xbf16>, vector<128x128xf32> -> vector<128x128xf32>
      %c0_20 = arith.constant 0 : index
      %c0_21 = arith.constant 0 : index
      %26 = vector.load %arg6[%c0_20, %c0_21] : memref<1x128xf32, #tpu.memory_space<vmem>>, vector<1x128xf32>
      %27 = vector.broadcast %26 : vector<1x128xf32> to vector<128x128xf32>
      %28 = arith.addf %25, %27 : vector<128x128xf32>
      %cst_22 = arith.constant 0.000000e+00 : f32
      %29 = vector.broadcast %cst_22 : f32 to vector<128x128xf32>
      %30 = arith.maximumf %28, %29 : vector<128x128xf32>
      %31 = arith.truncf %30 : vector<128x128xf32> to vector<128x128xbf16>
      %c0_23 = arith.constant 0 : index
      %c0_24 = arith.constant 0 : index
      %32 = vector.load %arg7[%c0_23, %c0_24] : memref<128x128xbf16, #tpu.memory_space<vmem>>, vector<128x128xbf16>
      tpu.vector_store %arg7[%c0_23, %c0_24], %31 {strides = array<i32>} : memref<128x128xbf16, #tpu.memory_space<vmem>>, vector<128x128xbf16>,
    } else {
    }
    return
  }
  func.func @transform_0(%arg0: i32, %arg1: i32) -> (i32, i32) {
    %c0_i32 = arith.constant 0 : i32
    return %arg0, %arg1 : i32, i32
  }
  func.func @transform_1(%arg0: i32, %arg1: i32) -> (i32, i32) {
    %c0_i32 = arith.constant 0 : i32
    %c0_i32_0 = arith.constant 0 : i32
    %c0_i32_1 = arith.constant 0 : i32
    return %c0_i32, %c0_i32_0 : i32, i32
  }
  func.func @transform_2(%arg0: i32, %arg1: i32) -> (i32, i32) {
    %c0_i32 = arith.constant 0 : i32
    %c0_i32_0 = arith.constant 0 : i32
    return %arg0, %c0_i32 : i32, i32
  }
  func.func @transform_3(%arg0: i32, %arg1: i32) -> (i32, i32) {
    %c0_i32 = arith.constant 0 : i32
    %c0_i32_0 = arith.constant 0 : i32
    %c0_i32_1 = arith.constant 0 : i32
    return %c0_i32, %c0_i32_0 : i32, i32
  }
  func.func @transform_4(%arg0: i32, %arg1: i32) -> (i32, i32) {
    %c0_i32 = arith.constant 0 : i32
    %c0_i32_0 = arith.constant 0 : i32
    %c0_i32_1 = arith.constant 0 : i32
    return %c0_i32, %c0_i32_0 : i32, i32
  }
  func.func @transform_5(%arg0: i32, %arg1: i32) -> (i32, i32) {
    %c0_i32 = arith.constant 0 : i32
    %c0_i32_0 = arith.constant 0 : i32
    return %arg0, %c0_i32 : i32, i32
  }
}

module attributes {stable_mosaic.version = 11 : i64} {
  func.func @kernel(%arg0: i32, %arg1: i32, %arg2: memref<128x256xi8, #tpu.memory_space<vmem>>, %arg3: memref<256x128xbf16, #tpu.memory_space<vmem>>, %arg4: memref<128x1xf32, #tpu.memory_space<vmem>>, %arg5: memref<256x128xbf16, #tpu.memory_space<vmem>>, %arg6: memref<1x128xf32, #tpu.memory_space<vmem>>, %arg7: memref<128x128xf32, #tpu.memory_space<vmem>>, %arg8: memref<1x128xf32, #tpu.memory_space<vmem>>, %arg9: memref<128x128xf32, #tpu.memory_space<vmem>>, %arg10: memref<128x256xf32, #tpu.memory_space<vmem>>) attributes {dimension_semantics = [#tpu.dimension_semantics<parallel>, #tpu.dimension_semantics<arbitrary>], iteration_bounds = array<i64: 2, 1>, scalar_prefetch = 0 : i64, scratch_operands = 1 : i64, tpu.core_type = #tpu.core_type<tc>, window_params = [{transform_indices = @transform_0, window_bounds = array<i64: 128, 256>}, {pipeline_mode = #tpu.pipeline_mode<synchronous>, transform_indices = @transform_1, window_bounds = array<i64: 256, 128>}, {transform_indices = @transform_2, window_bounds = array<i64: 128, 1>}, {pipeline_mode = #tpu.pipeline_mode<synchronous>, transform_indices = @transform_3, window_bounds = array<i64: 256, 128>}, {pipeline_mode = #tpu.pipeline_mode<synchronous>, transform_indices = @transform_4, window_bounds = array<i64: 1, 128>}, {pipeline_mode = #tpu.pipeline_mode<synchronous>, transform_indices = @transform_5, window_bounds = array<i64: 128, 128>}, {pipeline_mode = #tpu.pipeline_mode<synchronous>, transform_indices = @transform_6, window_bounds = array<i64: 1, 128>}, {transform_indices = @transform_7, window_bounds = array<i64: 128, 128>}]} {
    %c0_i32 = arith.constant 0 : i32
    %0 = arith.cmpi eq, %arg1, %c0_i32 : i32
    %1 = arith.extui %0 : i1 to i32
    %c0_i32_0 = arith.constant 0 : i32
    %2 = arith.cmpi ne, %1, %c0_i32_0 : i32
    scf.if %2 {
      %cst_9 = arith.constant 0.000000e+00 : f32
      %17 = vector.broadcast %cst_9 : f32 to vector<128x128xf32>
      %c0_10 = arith.constant 0 : index
      %c0_11 = arith.constant 0 : index
      %18 = vector.load %arg10[%c0_10, %c0_11] : memref<128x256xf32, #tpu.memory_space<vmem>>, vector<128x128xf32>
      tpu.vector_store %arg10[%c0_10, %c0_11], %17 {strides = array<i32>} : memref<128x256xf32, #tpu.memory_space<vmem>>, vector<128x128xf32>,
      %c128_i32 = arith.constant 128 : i32
      %19 = arith.muli %arg0, %c128_i32 : i32
      %20 = tpu.assume_multiple %19, 128 : i32
      %21 = arith.index_cast %20 : i32 to index
      %c0_12 = arith.constant 0 : index
      %22 = vector.load %arg3[%21, %c0_12] : memref<256x128xbf16, #tpu.memory_space<vmem>>, vector<128x128xbf16>
      %23 = arith.extf %22 : vector<128x128xbf16> to vector<128x128xf32>
      %c0_13 = arith.constant 0 : index
      %c128 = arith.constant 128 : index
      %24 = vector.load %arg10[%c0_13, %c128] : memref<128x256xf32, #tpu.memory_space<vmem>>, vector<128x128xf32>
      tpu.vector_store %arg10[%c0_13, %c128], %23 {strides = array<i32>} : memref<128x256xf32, #tpu.memory_space<vmem>>, vector<128x128xf32>,
    } else {
    }
    %c256_i32 = arith.constant 256 : i32
    %3 = arith.muli %arg1, %c256_i32 : i32
    %4 = tpu.assume_multiple %3, 256 : i32
    %c0 = arith.constant 0 : index
    %c0_1 = arith.constant 0 : index
    %5 = vector.load %arg2[%c0, %c0_1] : memref<128x256xi8, #tpu.memory_space<vmem>>, vector<128x256xi8>
    %6 = arith.sitofp %5 : vector<128x256xi8> to vector<128x256xf32>
    %7 = arith.truncf %6 : vector<128x256xf32> to vector<128x256xbf16>
    %c0_2 = arith.constant 0 : index
    %c0_3 = arith.constant 0 : index
    %8 = vector.load %arg10[%c0_2, %c0_3] : memref<128x256xf32, #tpu.memory_space<vmem>>, vector<128x128xf32>
    %9 = arith.index_cast %4 : i32 to index
    %c0_4 = arith.constant 0 : index
    %10 = vector.load %arg3[%9, %c0_4] : memref<256x128xbf16, #tpu.memory_space<vmem>>, vector<256x128xbf16>
    %cst = arith.constant dense<0.000000e+00> : vector<128x128xf32>
    %11 = tpu.matmul %7, %10, %cst {dimension_numbers = #tpu.dot_dimension_numbers<[1], [0], [0], [1], [0, 0, 1, 1], [], []>} : vector<128x256xbf16>, vector<256x128xbf16>, vector<128x128xf32> -> vector<128x128xf32>
    %12 = arith.addf %8, %11 : vector<128x128xf32>
    %c0_5 = arith.constant 0 : index
    %c0_6 = arith.constant 0 : index
    %13 = vector.load %arg10[%c0_5, %c0_6] : memref<128x256xf32, #tpu.memory_space<vmem>>, vector<128x128xf32>
    tpu.vector_store %arg10[%c0_5, %c0_6], %12 {strides = array<i32>} : memref<128x256xf32, #tpu.memory_space<vmem>>, vector<128x128xf32>,
    %c0_i32_7 = arith.constant 0 : i32
    %14 = arith.cmpi eq, %arg1, %c0_i32_7 : i32
    %15 = arith.extui %14 : i1 to i32
    %c0_i32_8 = arith.constant 0 : i32
    %16 = arith.cmpi ne, %15, %c0_i32_8 : i32
    scf.if %16 {
      %c0_9 = arith.constant 0 : index
      %c0_10 = arith.constant 0 : index
      %17 = vector.load %arg10[%c0_9, %c0_10] : memref<128x256xf32, #tpu.memory_space<vmem>>, vector<128x128xf32>
      %c0_11 = arith.constant 0 : index
      %c0_12 = arith.constant 0 : index
      %18 = vector.load %arg4[%c0_11, %c0_12] : memref<128x1xf32, #tpu.memory_space<vmem>>, vector<128x1xf32>
      %19 = vector.broadcast %18 : vector<128x1xf32> to vector<128x128xf32>
      %20 = arith.mulf %17, %19 : vector<128x128xf32>
      %c0_13 = arith.constant 0 : index
      %c0_14 = arith.constant 0 : index
      %21 = vector.load %arg10[%c0_13, %c0_14] : memref<128x256xf32, #tpu.memory_space<vmem>>, vector<128x128xf32>
      tpu.vector_store %arg10[%c0_13, %c0_14], %20 {strides = array<i32>} : memref<128x256xf32, #tpu.memory_space<vmem>>, vector<128x128xf32>,
      %c0_15 = arith.constant 0 : index
      %c0_16 = arith.constant 0 : index
      %22 = vector.load %arg10[%c0_15, %c0_16] : memref<128x256xf32, #tpu.memory_space<vmem>>, vector<128x256xf32>
      %23 = arith.truncf %22 : vector<128x256xf32> to vector<128x256xbf16>
      %c0_17 = arith.constant 0 : index
      %c0_18 = arith.constant 0 : index
      %24 = vector.load %arg5[%c0_17, %c0_18] : memref<256x128xbf16, #tpu.memory_space<vmem>>, vector<256x128xbf16>
      %cst_19 = arith.constant dense<0.000000e+00> : vector<128x128xf32>
      %25 = tpu.matmul %23, %24, %cst_19 {dimension_numbers = #tpu.dot_dimension_numbers<[1], [0], [0], [1], [0, 0, 1, 1], [], []>} : vector<128x256xbf16>, vector<256x128xbf16>, vector<128x128xf32> -> vector<128x128xf32>
      %c0_20 = arith.constant 0 : index
      %c0_21 = arith.constant 0 : index
      %26 = vector.load %arg6[%c0_20, %c0_21] : memref<1x128xf32, #tpu.memory_space<vmem>>, vector<1x128xf32>
      %27 = vector.broadcast %26 : vector<1x128xf32> to vector<128x128xf32>
      %28 = arith.addf %25, %27 : vector<128x128xf32>
      %cst_22 = arith.constant 0.000000e+00 : f32
      %29 = vector.broadcast %cst_22 : f32 to vector<128x128xf32>
      %30 = arith.maximumf %28, %29 : vector<128x128xf32>
      %c0_23 = arith.constant 0 : index
      %c0_24 = arith.constant 0 : index
      %31 = vector.load %arg7[%c0_23, %c0_24] : memref<128x128xf32, #tpu.memory_space<vmem>>, vector<128x128xf32>
      %cst_25 = arith.constant dense<0.000000e+00> : vector<128x128xf32>
      %32 = tpu.matmul %30, %31, %cst_25 {dimension_numbers = #tpu.dot_dimension_numbers<[1], [0], [0], [1], [0, 0, 1, 1], [], []>} : vector<128x128xf32>, vector<128x128xf32>, vector<128x128xf32> -> vector<128x128xf32>
      %c0_26 = arith.constant 0 : index
      %c0_27 = arith.constant 0 : index
      %33 = vector.load %arg8[%c0_26, %c0_27] : memref<1x128xf32, #tpu.memory_space<vmem>>, vector<1x128xf32>
      %34 = vector.broadcast %33 : vector<1x128xf32> to vector<128x128xf32>
      %35 = arith.addf %32, %34 : vector<128x128xf32>
      %c0_28 = arith.constant 0 : index
      %c0_29 = arith.constant 0 : index
      %36 = vector.load %arg9[%c0_28, %c0_29] : memref<128x128xf32, #tpu.memory_space<vmem>>, vector<128x128xf32>
      tpu.vector_store %arg9[%c0_28, %c0_29], %35 {strides = array<i32>} : memref<128x128xf32, #tpu.memory_space<vmem>>, vector<128x128xf32>,
    } else {
    }
    return
  }
  func.func @transform_0(%arg0: i32, %arg1: i32) -> (i32, i32) {
    %c0_i32 = arith.constant 0 : i32
    return %arg0, %arg1 : i32, i32
  }
  func.func @transform_1(%arg0: i32, %arg1: i32) -> (i32, i32) {
    %c0_i32 = arith.constant 0 : i32
    %c0_i32_0 = arith.constant 0 : i32
    %c0_i32_1 = arith.constant 0 : i32
    return %c0_i32, %c0_i32_0 : i32, i32
  }
  func.func @transform_2(%arg0: i32, %arg1: i32) -> (i32, i32) {
    %c0_i32 = arith.constant 0 : i32
    %c0_i32_0 = arith.constant 0 : i32
    return %arg0, %c0_i32 : i32, i32
  }
  func.func @transform_3(%arg0: i32, %arg1: i32) -> (i32, i32) {
    %c0_i32 = arith.constant 0 : i32
    %c0_i32_0 = arith.constant 0 : i32
    %c0_i32_1 = arith.constant 0 : i32
    return %c0_i32, %c0_i32_0 : i32, i32
  }
  func.func @transform_4(%arg0: i32, %arg1: i32) -> (i32, i32) {
    %c0_i32 = arith.constant 0 : i32
    %c0_i32_0 = arith.constant 0 : i32
    %c0_i32_1 = arith.constant 0 : i32
    return %c0_i32, %c0_i32_0 : i32, i32
  }
  func.func @transform_5(%arg0: i32, %arg1: i32) -> (i32, i32) {
    %c0_i32 = arith.constant 0 : i32
    %c0_i32_0 = arith.constant 0 : i32
    %c0_i32_1 = arith.constant 0 : i32
    return %c0_i32, %c0_i32_0 : i32, i32
  }
  func.func @transform_6(%arg0: i32, %arg1: i32) -> (i32, i32) {
    %c0_i32 = arith.constant 0 : i32
    %c0_i32_0 = arith.constant 0 : i32
    %c0_i32_1 = arith.constant 0 : i32
    return %c0_i32, %c0_i32_0 : i32, i32
  }
  func.func @transform_7(%arg0: i32, %arg1: i32) -> (i32, i32) {
    %c0_i32 = arith.constant 0 : i32
    %c0_i32_0 = arith.constant 0 : i32
    return %arg0, %c0_i32 : i32, i32
  }
}

</mosaic_0001>

<bundles_post_ra>
// kernel: sage_forward.2
= control target key start
LH: loop header
LB: loop body
LE: loop exit
PB: predicated region body
PF: predicated region fallthrough
CT: control target
= control target key end

     0   :  { %s1628_s18 = smov 0   ;;  %s1630_s19 = smov 0   ;;  %s1841_s0 = inlined_call_operand.vmem [shape: s8[256,256], index: 0, kind: input, shape index: {}]   ;;  %s1842_s1 = inlined_call_operand.vmem [shape: bf16[256,128], index: 1, kind: input, shape index: {}]   ;;  %s1843_s2 = inlined_call_operand.vmem [shape: f32[256,1], index: 2, kind: input, shape index: {}]   ;;  %s1844_s3 = inlined_call_operand.vmem [shape: bf16[256,128], index: 3, kind: input, shape index: {}]   ;;  %s1845_s4 = inlined_call_operand.vmem [shape: f32[1,128], index: 4, kind: input, shape index: {}]   ;;  %s1846_s5 = inlined_call_operand.vmem [shape: bf16[256,128], index: 5, kind: output, shape index: {}]  }
   0x1   :  { %s1632_s20 = smov 0  }
   0x2 LB: > { %s27_s21 = sadd.s32 1, %s1591_s19  ;;  %p1285_p0 = scmp.ge.s32.totalorder %s1595_s20, 1  ;;  %s1595_s20 = sphi %s1632_s20, %s15_s20   ;;  %s1591_s19 = sphi %s1630_s19, %s1848_s19   ;;  %s1587_s18 = sphi %s1628_s18, %s1847_s18  }
   0x3   : > { %p29_p1 = scmp.ge.s32.totalorder %s27_s21, 2  ;;  %p219_p2 = scmp.lt.s32.totalorder %s1595_s20, 3 }
   0x5   : > { %s1850_s21 = smov (%p29_p1, %s27_s21), 0  ;;  %p220_p3 = pnand %p1285_p0, %p219_p2 }
   0x6   : > { %s1289_s26 = sshll.u32 (!%p220_p3), %s1587_s18, 4  ;;  %s1286_s27 = sshll.u32 (!%p220_p3), %s1587_s18, 2 }
   0x7   : > { %223 = sbr.rel (%p220_p3) target bundleno = 446 (0x1be), region = 40  ;;  %p270_p4 = scmp.lt.s32.totalorder (!%p220_p3), %s1289_s26, 31 }
   0x8   : > { %p259_p5 = scmp.lt.s32.totalorder (!%p220_p3), %s1286_s27, 7 }
   0xc   : > { %v1433_v0 = vld [vmem:[%s1842_s1 + $0x38] sm:$0xff]  ;;  %v1597_v2 = vmov 0   ;;  %v1432_v3 = vld [vmem:[%s1842_s1 + $0x30] sm:$0xff]  ;;  %s1852_s26 = smov (!%p270_p4, %s1289_s26), 31  ;;  %v1431_v5 = vld [vmem:[%s1842_s1 + $0x28] sm:$0xff]  ;;  %s1854_s27 = smov (!%p259_p5, %s1286_s27), 7 }
   0xd   : > { %v1441_v1 = vld [vmem:[%s1842_s1 + $0x78] sm:$0xff]  ;;  %1569 = vset.pattern.permute.xlu0 %v1597_v2  ;;  %1570 = vset.pattern.permute.xlu1 %v1597_v2  ;;  %v1440_v4 = vld [vmem:[%s1842_s1 + $0x70] sm:$0xff]  ;;  %s1290_s7 = sshll.u32 %s1852_s26, 3  ;;  %v1439_v6 = vld [vmem:[%s1842_s1 + $0x68] sm:$0xff]  ;;  %s1425_s23 = sshll.u32 %s1854_s27, 4 }
   0xe   : > { %591 = vmatpush.bf16.msra.mxu0 %v1433_v0  ;;  %640 = vmatpush.bf16.msra.mxu1 %v1441_v1  ;;  %s1668_s10 = scalar_lea.vmem %s1843_s2, %s1290_s7  ;;  %v1430_v9 = vld [vmem:[%s1842_s1 + $0x20] sm:$0xff]  ;;  %v1429_v12 = vld [vmem:[%s1842_s1 + $0x18] sm:$0xff]  ;;  %s1695_s7 = scalar_lea.vmem %s1841_s0, %s1425_s23  ;;  %v1428_v15 = vld [vmem:[%s1842_s1 + $0x10] sm:$0xff] }
   0xf   : > { %1571 = vset.pattern.permute.xlu2 %v1597_v2  ;;  %v740_v7 = vld [vmem:[%s1668_s10] sm:$0xff]  ;;  %v742_v8 = vld [vmem:[%s1668_s10 + $0x10] sm:$0xff]  ;;  %v741_v11 = vld [vmem:[%s1668_s10 + $0x8] sm:$0xff]  ;;  %s1292_s23 = sshll.u32 %s1852_s26, 2 }
  0x10   : > { %758 = vperm.xlu0 %1569, %v740_v7   ;;  %768 = vperm.xlu1 %1570, %v742_v8   ;;  %v1438_v10 = vld [vmem:[%s1842_s1 + $0x60] sm:$0xff]  ;;  %v1437_v13 = vld [vmem:[%s1842_s1 + $0x58] sm:$0xff]  ;;  %v1436_v16 = vld [vmem:[%s1842_s1 + $0x50] sm:$0xff]  ;;  %s1808_s25 = scalar_lea.vmem %s1846_s5, %s1292_s23 }
  0x11   : > { %v743_v14 = vld [vmem:[%s1668_s10 + $0x18] sm:$0xff]  ;;  %v355_v17 = vld [vmem:[%s1695_s7] sm:$0xff]  ;;  %v356_v18 = vld [vmem:[%s1695_s7 + $0x8] sm:$0xff] }
  0x12   : > { %592 = vmatpush.bf16.msra.mxu0 %v1432_v3  ;;  %641 = vmatpush.bf16.msra.mxu1 %v1440_v4  ;;  %v746_v19 = vld [vmem:[%s1668_s10 + $0x30] sm:$0xff]  ;;  %v363_v20 = vunpack.c.0.s8 %v355_v17  ;;  %v365_v21 = vunpack.c.1.s8 %v355_v17  ;;  %v364_v22 = vunpack.c.0.s8 %v356_v18  ;;  %v366_v23 = vunpack.c.1.s8 %v356_v18  ;;  %v1427_v24 = vld [vmem:[%s1842_s1 + $0x8] sm:$0xff]  ;;  %v747_v26 = vld [vmem:[%s1668_s10 + $0x38] sm:$0xff] }
  0x13   : > { %v1435_v25 = vld [vmem:[%s1842_s1 + $0x48] sm:$0xff]  ;;  %v1426_v31 = vld [vmem:[%s1842_s1] sm:$0xff]  ;;  %v750_v36 = vld [vmem:[%s1668_s10 + $0x50] sm:$0xff]  ;;  %v367_v39 = vunpack.c.2.s8 %v355_v17  ;;  %v369_v40 = vunpack.c.3.s8 %v355_v17  ;;  %v368_v41 = vunpack.c.2.s8 %v356_v18  ;;  %v370_v42 = vunpack.c.3.s8 %v356_v18 }
  0x14   : > { %v395_v27 = vcvt.s32.f32 %v363_v20  ;;  %v397_v28 = vcvt.s32.f32 %v365_v21  ;;  %v396_v29 = vcvt.s32.f32 %v364_v22  ;;  %v398_v30 = vcvt.s32.f32 %v366_v23  ;;  %v1434_v32 = vld [vmem:[%s1842_s1 + $0x40] sm:$0xff]  ;;  %v749_v33 = vld [vmem:[%s1668_s10 + $0x48] sm:$0xff]  ;;  %v755_v49 = vld [vmem:[%s1668_s10 + $0x78] sm:$0xff] }
  0x15   : > { %v744_v37 = vld [vmem:[%s1668_s10 + $0x20] sm:$0xff]  ;;  %v753_v43 = vld [vmem:[%s1668_s10 + $0x68] sm:$0xff]  ;;  %v399_v45 = vcvt.s32.f32 %v367_v39  ;;  %v401_v46 = vcvt.s32.f32 %v369_v40  ;;  %v400_v47 = vcvt.s32.f32 %v368_v41  ;;  %v402_v48 = vcvt.s32.f32 %v370_v42  ;;  %v357_v53 = vld [vmem:[%s1695_s7 + $0x10] sm:$0xff] }
  0x16   : > { %593 = vmatpush.bf16.msra.mxu0 %v1431_v5  ;;  %642 = vmatpush.bf16.msra.mxu1 %v1439_v6  ;;  %v427_v34 = vpack.c.bf16 %v397_v28, %v395_v27  ;;  %v428_v35 = vpack.c.bf16 %v398_v30, %v396_v29  ;;  %v752_v38 = vld [vmem:[%s1668_s10 + $0x60] sm:$0xff]  ;;  %v745_v44 = vld [vmem:[%s1668_s10 + $0x28] sm:$0xff]  ;;  %v358_v54 = vld [vmem:[%s1695_s7 + $0x18] sm:$0xff]  ;;  %v371_v55 = vunpack.c.0.s8 %v357_v53  ;;  %v373_v56 = vunpack.c.1.s8 %v357_v53 }
  0x17   : > { %778 = vperm.xlu2 %1571, %v744_v37   ;;  %v429_v50 = vpack.c.bf16 %v401_v46, %v399_v45  ;;  %v430_v51 = vpack.c.bf16 %v402_v48, %v400_v47  ;;  %v748_v52 = vld [vmem:[%s1668_s10 + $0x40] sm:$0xff]  ;;  %v372_v57 = vunpack.c.0.s8 %v358_v54  ;;  %v374_v58 = vunpack.c.1.s8 %v358_v54  ;;  %v751_v59 = vld [vmem:[%s1668_s10 + $0x58] sm:$0xff]  ;;  %v754_v2 = vld [vmem:[%s1668_s10 + $0x70] sm:$0xff]  ;;  %s1293_s10 = sshll.u32 %s1587_s18, 7 }
  0x18   : > { %763 = vperm.xlu0 %1569, %v741_v11   ;;  %773 = vperm.xlu1 %1570, %v743_v14   ;;  %v403_v60 = vcvt.s32.f32 %v371_v55  ;;  %v405_v61 = vcvt.s32.f32 %v373_v56  ;;  %v375_v3 = vunpack.c.2.s8 %v357_v53  ;;  %v377_v4 = vunpack.c.3.s8 %v357_v53  ;;  %v360_v14 = vld [vmem:[%s1695_s7 + $0x28] sm:$0xff]  ;;  %v1448_v39 = vld [vmem:[%s1844_s3 + $0x30] sm:$0xff]  ;;  %v362_v41 = vld [vmem:[%s1695_s7 + $0x38] sm:$0xff]  ;;  %s302_s28 = sshra.s32 %s1293_s10, 3 }
  0x19   : > { %v404_v62 = vcvt.s32.f32 %v372_v57  ;;  %v406_v63 = vcvt.s32.f32 %v374_v58  ;;  %v376_v5 = vunpack.c.2.s8 %v358_v54  ;;  %v378_v6 = vunpack.c.3.s8 %v358_v54  ;;  %v361_v40 = vld [vmem:[%s1695_s7 + $0x30] sm:$0xff]  ;;  %v1454_v42 = vld [vmem:[%s1844_s3 + $0x60] sm:$0xff]  ;;  %v1445_v55 = vld [vmem:[%s1844_s3 + $0x18] sm:$0xff]  ;;  %s1294_s8 = sshll.u32 %s302_s28, 2 }
  0x1a   : > { %594 = vmatpush.bf16.msra.mxu0 %v1430_v9  ;;  %643 = vmatpush.bf16.msra.mxu1 %v1438_v10  ;;  %v431_v0 = vpack.c.bf16 %v405_v61, %v403_v60  ;;  %v407_v7 = vcvt.s32.f32 %v375_v3  ;;  %v409_v8 = vcvt.s32.f32 %v377_v4  ;;  %v380_v17 = vunpack.c.0.s8 %v360_v14  ;;  %v1452_v54 = vld [vmem:[%s1844_s3 + $0x50] sm:$0xff]  ;;  %v1451_v58 = vld [vmem:[%s1844_s3 + $0x48] sm:$0xff]  ;;  %v1450_v60 = vld [vmem:[%s1844_s3 + $0x40] sm:$0xff]  ;;  %s1781_s13 = scalar_lea.vmem %s1842_s1, %s1294_s8 }
  0x1b   : > { %v432_v1 = vpack.c.bf16 %v406_v63, %v404_v62  ;;  %v408_v9 = vcvt.s32.f32 %v376_v5  ;;  %v410_v10 = vcvt.s32.f32 %v378_v6  ;;  %v382_v18 = vunpack.c.1.s8 %v360_v14  ;;  %v1443_v61 = vld [vmem:[%s1844_s3 + $0x8] sm:$0xff]  ;;  %v1442_v3 = vld [vmem:[%s1844_s3] sm:$0xff] }
  0x1c   : > { %v433_v11 = vpack.c.bf16 %v409_v8, %v407_v7  ;;  %v412_v21 = vcvt.s32.f32 %v380_v17  ;;  %v384_v28 = vunpack.c.2.s8 %v360_v14  ;;  %v386_v29 = vunpack.c.3.s8 %v360_v14  ;;  %v1531_v17 = vld [vmem:[%s1781_s13 + $0x10] sm:$0xff]  }
  0x1d   : > { %v414_v22 = vcvt.s32.f32 %v382_v18  ;;  %v387_v45 = vunpack.c.0.s8 %v361_v40  ;;  %v389_v46 = vunpack.c.1.s8 %v361_v40  ;;  %v388_v47 = vunpack.c.0.s8 %v362_v41 }
  0x1e   : > { %595 = vmatpush.bf16.msra.mxu0 %v1429_v12  ;;  %644 = vmatpush.bf16.msra.mxu1 %v1437_v13  ;;  %v434_v12 = vpack.c.bf16 %v410_v10, %v408_v9  ;;  %v359_v13 = vld [vmem:[%s1695_s7 + $0x20] sm:$0xff]  ;;  %v390_v48 = vunpack.c.1.s8 %v362_v41  ;;  %v391_v62 = vunpack.c.2.s8 %v361_v40  ;;  %v393_v63 = vunpack.c.3.s8 %v361_v40  ;;  %v1530_v10 = vld [vmem:[%s1781_s13 + $0x8] sm:$0xff]  }
  0x1f   : > { %783 = vperm.xlu2 %1571, %v745_v44   ;;  %v385_v27 = vunpack.c.3.s8 %v359_v13  ;;  %v1453_v44 = vld [vmem:[%s1844_s3 + $0x58] sm:$0xff] }
  0x20   : > { %788 = vperm.xlu0 %1569, %v746_v19   ;;  %793 = vperm.xlu1 %1570, %v747_v26   ;;  %v383_v26 = vunpack.c.2.s8 %v359_v13  ;;  %v422_v53 = vcvt.s32.f32 %v390_v48  ;;  %v423_v4 = vcvt.s32.f32 %v391_v62  ;;  %v425_v5 = vcvt.s32.f32 %v393_v63 }
  0x22   : > { %596 = vmatpush.bf16.msra.mxu0 %v1428_v15  ;;  %645 = vmatpush.bf16.msra.mxu1 %v1436_v16  ;;  %v379_v15 = vunpack.c.0.s8 %v359_v13  ;;  %v381_v16 = vunpack.c.1.s8 %v359_v13  ;;  %v415_v30 = vcvt.s32.f32 %v383_v26  ;;  %v441_v8 = vpack.c.bf16 %v425_v5, %v423_v4 }
  0x24   : > { %v411_v19 = vcvt.s32.f32 %v379_v15  ;;  %v413_v20 = vcvt.s32.f32 %v381_v16 }
  0x26   : > { %597 = vmatpush.bf16.msra.mxu0 %v1427_v24  ;;  %646 = vmatpush.bf16.msra.mxu1 %v1435_v25  ;;  %v435_v23 = vpack.c.bf16 %v413_v20, %v411_v19  ;;  %v436_v24 = vpack.c.bf16 %v414_v22, %v412_v21  ;;  %v1457_v25 = vld [vmem:[%s1844_s3 + $0x78] sm:$0xff] }
  0x27   : > { %798 = vperm.xlu2 %1571, %v748_v52   ;;  %1097 = vmatpush.bf16.msra.mxu3 %v1457_v25  ;;  %v420_v52 = vcvt.s32.f32 %v388_v47 }
  0x28   : > { %803 = vperm.xlu0 %1569, %v749_v33   ;;  %808 = vperm.xlu1 %1570, %v750_v36   ;;  %v418_v33 = vcvt.s32.f32 %v386_v29  ;;  %v1455_v36 = vld [vmem:[%s1844_s3 + $0x68] sm:$0xff]  ;;  %v1532_v29 = vld [vmem:[%s1781_s13 + $0x18] sm:$0xff]  }
  0x29   : > { %v440_v57 = vpack.c.bf16 %v422_v53, %v420_v52  ;;  %v1534_v52 = vld [vmem:[%s1781_s13 + $0x28] sm:$0xff]  }
  0x2a   : > { %598 = vmatpush.bf16.msra.mxu0 %v1426_v31  ;;  %647 = vmatpush.bf16.msra.mxu1 %v1434_v32  ;;  %v417_v31 = vcvt.s32.f32 %v385_v27  ;;  %v416_v32 = vcvt.s32.f32 %v384_v28 }
  0x2c   : > { %v437_v37 = vpack.c.bf16 %v417_v31, %v415_v30 }
  0x2d   : > { %599 = vmatmul.bf16.vlgmr.msra.gmra.mxu0 %v427_v34  ;;  %648 = vmatmul.bf16.vlgmr.msra.gmra.mxu1 %v428_v35  ;;  %v1456_v34 = vld [vmem:[%s1844_s3 + $0x70] sm:$0xff]  ;;  %v1449_v35 = vld [vmem:[%s1844_s3 + $0x38] sm:$0xff] }
  0x2e   : > { %1098 = vmatpush.bf16.msra.mxu3 %v1456_v34  ;;  %1048 = vmatpush.bf16.msra.mxu2 %v1449_v35 }
  0x2f   : > { %813 = vperm.xlu2 %1571, %v751_v59   ;;  %v1444_v59 = vld [vmem:[%s1844_s3 + $0x10] sm:$0xff] }
  0x30   : > { %818 = vperm.xlu0 %1569, %v752_v38   ;;  %823 = vperm.xlu1 %1570, %v753_v43   ;;  %v438_v38 = vpack.c.bf16 %v418_v33, %v416_v32  ;;  %v1447_v43 = vld [vmem:[%s1844_s3 + $0x28] sm:$0xff] }
  0x32   : > { %1099 = vmatpush.bf16.msra.mxu3 %v1455_v36  ;;  %1049 = vmatpush.bf16.msra.mxu2 %v1448_v39 }
  0x36   : > { %1100 = vmatpush.bf16.msra.mxu3 %v1454_v42  ;;  %1050 = vmatpush.bf16.msra.mxu2 %v1447_v43 }
  0x37   : > { %828 = vperm.xlu2 %1571, %v754_v2   ;;  %v1459_v2 = vld [vmem:[%s1781_s13] sm:$0xff]  }
  0x38   : > { %833 = vperm.xlu0 %1569, %v755_v49   ;;  %v1446_v49 = vld [vmem:[%s1844_s3 + $0x20] sm:$0xff] }
  0x3a   : > { %1101 = vmatpush.bf16.msra.mxu3 %v1453_v44  ;;  %1051 = vmatpush.bf16.msra.mxu2 %v1446_v49 }
  0x3d   : > { %604 = vmatmul.bf16.gmra.mxu0 %v429_v50  ;;  %653 = vmatmul.bf16.gmra.mxu1 %v430_v51  ;;  %v419_v50 = vcvt.s32.f32 %v387_v45  ;;  %v421_v51 = vcvt.s32.f32 %v389_v46 }
  0x3e   : > { %1102 = vmatpush.bf16.msra.mxu3 %v1452_v54  ;;  %1052 = vmatpush.bf16.msra.mxu2 %v1445_v55 }
  0x3f   : > { %v439_v56 = vpack.c.bf16 %v421_v51, %v419_v50 }
  0x42   : > { %1103 = vmatpush.bf16.msra.mxu3 %v1451_v58  ;;  %1053 = vmatpush.bf16.msra.mxu2 %v1444_v59 }
  0x46   : > { %1104 = vmatpush.bf16.msra.mxu3 %v1450_v60  ;;  %1054 = vmatpush.bf16.msra.mxu2 %v1443_v61 }
  0x49   : > { %1105 = vmatmul.bf16.vlgmr.msra.gmra.mxu3 %v1459_v2 }
  0x4a   : > { %1055 = vmatpush.bf16.msra.mxu2 %v1442_v3 }
  0x4d   : > { %609 = vmatmul.bf16.gmra.mxu0 %v431_v0  ;;  %658 = vmatmul.bf16.gmra.mxu1 %v432_v1  ;;  %v392_v0 = vunpack.c.2.s8 %v362_v41  ;;  %v394_v1 = vunpack.c.3.s8 %v362_v41  ;;  %v1533_v41 = vld [vmem:[%s1781_s13 + $0x20] sm:$0xff]  }
  0x4f   : > { %v424_v6 = vcvt.s32.f32 %v392_v0  ;;  %v426_v7 = vcvt.s32.f32 %v394_v1  ;;  %v1535_v0 = vld [vmem:[%s1781_s13 + $0x30] sm:$0xff]  }
  0x51   : > { %v442_v9 = vpack.c.bf16 %v426_v7, %v424_v6 }
  0x59   : > { %1110 = vmatmul.bf16.gmra.mxu3 %v1530_v10 }
  0x5d   : > { %614 = vmatmul.bf16.gmra.mxu0 %v433_v11  ;;  %663 = vmatmul.bf16.gmra.mxu1 %v434_v12 }
  0x69   : > { %1115 = vmatmul.bf16.gmra.mxu3 %v1531_v17 }
  0x6d   : > { %619 = vmatmul.bf16.gmra.mxu0 %v435_v23  ;;  %668 = vmatmul.bf16.gmra.mxu1 %v436_v24 }
  0x71   : > { %v779_v35 = vpop.permute.xlu2 %778 }
  0x79   : > { %1120 = vmatmul.bf16.gmra.mxu3 %v1532_v29  ;;  %v784_v43 = vpop.permute.xlu2 %783 }
  0x7d   : > { %624 = vmatmul.bf16.gmra.mxu0 %v437_v37  ;;  %673 = vmatmul.bf16.gmra.mxu1 %v438_v38 }
  0x81   : > { %v799_v3 = vpop.permute.xlu2 %798 }
  0x82   : > { %v759_v11 = vpop.permute.xlu0 %758  ;;  %v769_v23 = vpop.permute.xlu1 %768 }
  0x89   : > { %1125 = vmatmul.bf16.gmra.mxu3 %v1533_v41 }
  0x8a   : > { %v764_v19 = vpop.permute.xlu0 %763  ;;  %v774_v31 = vpop.permute.xlu1 %773 }
  0x8d   : > { %629 = vmatmul.bf16.gmra.mxu0 %v439_v56  ;;  %678 = vmatmul.bf16.gmra.mxu1 %v440_v57 }
  0x92   : > { %v789_v54 = vpop.permute.xlu0 %788  ;;  %v794_v55 = vpop.permute.xlu1 %793 }
  0x99   : > { %1130 = vmatmul.bf16.gmra.mxu3 %v1534_v52 }
  0x9a   : > { %v804_v2 = vpop.permute.xlu0 %803 }
  0x9d   : > { %634 = vmatmul.bf16.gmra.mxu0 %v441_v8  ;;  %683 = vmatmul.bf16.gmra.mxu1 %v442_v9 }
  0xa9   : > { %1135 = vmatmul.bf16.gmra.mxu3 %v1535_v0 }
  0xaa   : > { %v600_v12 = vpop.f32.mrf.mxu0  ;;  %v649_v13 = vpop.f32.mrf.mxu1 }
  0xab   : > { %v650_v14 = vadd.f32 %v649_v13, %v600_v12  ;;  %v1536_v12 = vld [vmem:[%s1781_s13 + $0x38] sm:$0xff]  }
  0xad   : > { %v836_v20 = vmul.f32 %v759_v11, %v650_v14  ;;  %v809_v14 = vpop.permute.xlu1 %808 }
  0xb2   : > { %v602_v15 = vpop.f32.mrf.mxu0  ;;  %v651_v16 = vpop.f32.mrf.mxu1 }
  0xb3   : > { %v652_v18 = vadd.f32 %v651_v16, %v602_v15  ;;  %v814_v15 = vpop.permute.xlu2 %813 }
  0xb5   : > { %v837_v21 = vmul.f32 %v764_v19, %v652_v18 }
  0xb7   : > { %v900_v22 = vpack.c.bf16 %v837_v21, %v836_v20 }
  0xb9   : > { %1056 = vmatmul.bf16.vlgmr.msra.gmra.mxu2 %v900_v22  ;;  %1140 = vmatmul.bf16.gmra.mxu3 %v1536_v12 }
  0xba   : > { %v605_v24 = vpop.f32.mrf.mxu0  ;;  %v654_v25 = vpop.f32.mrf.mxu1 }
  0xbb   : > { %v655_v26 = vadd.f32 %v654_v25, %v605_v24  ;;  %v819_v25 = vpop.permute.xlu0 %818 }
  0xbd   : > { %v838_v32 = vmul.f32 %v769_v23, %v655_v26  ;;  %v824_v26 = vpop.permute.xlu1 %823 }
  0xc2   : > { %v607_v27 = vpop.f32.mrf.mxu0  ;;  %v656_v28 = vpop.f32.mrf.mxu1 }
  0xc3   : > { %v657_v30 = vadd.f32 %v656_v28, %v607_v27 }
  0xc5   : > { %v839_v33 = vmul.f32 %v774_v31, %v657_v30 }
  0xc7   : > { %v902_v34 = vpack.c.bf16 %v839_v33, %v838_v32 }
  0xc9   : > { %1061 = vmatmul.bf16.gmra.mxu2 %v902_v34 }
  0xca   : > { %v610_v36 = vpop.f32.mrf.mxu0  ;;  %v659_v37 = vpop.f32.mrf.mxu1 }
  0xcb   : > { %v660_v38 = vadd.f32 %v659_v37, %v610_v36  ;;  %v834_v37 = vpop.permute.xlu0 %833 }
  0xcc   : > { %v1106_v32 = vpop.f32.mrf.mxu3 }
  0xcd   : > { %v840_v44 = vmul.f32 %v779_v35, %v660_v38  ;;  %v829_v38 = vpop.permute.xlu2 %828 }
  0xd2   : > { %v612_v39 = vpop.f32.mrf.mxu0  ;;  %v661_v40 = vpop.f32.mrf.mxu1 }
  0xd3   : > { %v662_v42 = vadd.f32 %v661_v40, %v612_v39 }
  0xd5   : > { %v841_v45 = vmul.f32 %v784_v43, %v662_v42  ;;  %v1108_v42 = vpop.f32.mrf.mxu3 }
  0xd7   : > { %v904_v46 = vpack.c.bf16 %v841_v45, %v840_v44  ;;  %v1800_v45 = vld [vmem:[%s1845_s4] ss:$0 sm:$0xff] }
  0xd9   : > { %1066 = vmatmul.bf16.gmra.mxu2 %v904_v46 }
  0xda   : > { %v615_v47 = vpop.f32.mrf.mxu0  ;;  %v664_v48 = vpop.f32.mrf.mxu1 }
  0xdb   : > { %v665_v49 = vadd.f32 %v664_v48, %v615_v47 }
  0xdd   : > { %v842_v56 = vmul.f32 %v789_v54, %v665_v49  ;;  %v1111_v43 = vpop.f32.mrf.mxu3 }
  0xe2   : > { %v617_v50 = vpop.f32.mrf.mxu0  ;;  %v666_v51 = vpop.f32.mrf.mxu1 }
  0xe3   : > { %v667_v53 = vadd.f32 %v666_v51, %v617_v50 }
  0xe5   : > { %v843_v57 = vmul.f32 %v794_v55, %v667_v53  ;;  %v1113_v46 = vpop.f32.mrf.mxu3 }
  0xe7   : > { %v906_v58 = vpack.c.bf16 %v843_v57, %v842_v56 }
  0xe9   : > { %1071 = vmatmul.bf16.gmra.mxu2 %v906_v58 }
  0xea   : > { %v620_v59 = vpop.f32.mrf.mxu0  ;;  %v669_v60 = vpop.f32.mrf.mxu1 }
  0xeb   : > { %v670_v61 = vadd.f32 %v669_v60, %v620_v59 }
  0xed   : > { %v844_v4 = vmul.f32 %v799_v3, %v670_v61  ;;  %v1116_v52 = vpop.f32.mrf.mxu3 }
  0xf2   : > { %v622_v62 = vpop.f32.mrf.mxu0  ;;  %v671_v63 = vpop.f32.mrf.mxu1 }
  0xf3   : > { %v672_v1 = vadd.f32 %v671_v63, %v622_v62 }
  0xf5   : > { %v845_v5 = vmul.f32 %v804_v2, %v672_v1  ;;  %v1118_v58 = vpop.f32.mrf.mxu3 }
  0xf7   : > { %v908_v6 = vpack.c.bf16 %v845_v5, %v844_v4 }
  0xf9   : > { %1076 = vmatmul.bf16.gmra.mxu2 %v908_v6 }
  0xfa   : > { %v625_v7 = vpop.f32.mrf.mxu0  ;;  %v674_v8 = vpop.f32.mrf.mxu1 }
  0xfb   : > { %v675_v9 = vadd.f32 %v674_v8, %v625_v7 }
  0xfd   : > { %v846_v16 = vmul.f32 %v809_v14, %v675_v9  ;;  %v1121_v3 = vpop.f32.mrf.mxu3 }
 0x102   : > { %v627_v10 = vpop.f32.mrf.mxu0  ;;  %v676_v11 = vpop.f32.mrf.mxu1 }
 0x103   : > { %v677_v13 = vadd.f32 %v676_v11, %v627_v10 }
 0x105   : > { %v847_v17 = vmul.f32 %v814_v15, %v677_v13  ;;  %v1123_v8 = vpop.f32.mrf.mxu3 }
 0x107   : > { %v910_v18 = vpack.c.bf16 %v847_v17, %v846_v16 }
 0x109   : > { %1081 = vmatmul.bf16.gmra.mxu2 %v910_v18 }
 0x10a   : > { %v630_v19 = vpop.f32.mrf.mxu0  ;;  %v679_v20 = vpop.f32.mrf.mxu1 }
 0x10b   : > { %v680_v21 = vadd.f32 %v679_v20, %v630_v19 }
 0x10d   : > { %v848_v27 = vmul.f32 %v819_v25, %v680_v21  ;;  %v1126_v14 = vpop.f32.mrf.mxu3 }
 0x112   : > { %v632_v22 = vpop.f32.mrf.mxu0  ;;  %v681_v23 = vpop.f32.mrf.mxu1 }
 0x113   : > { %v682_v24 = vadd.f32 %v681_v23, %v632_v22 }
 0x115   : > { %v849_v28 = vmul.f32 %v824_v26, %v682_v24  ;;  %v1128_v22 = vpop.f32.mrf.mxu3 }
 0x117   : > { %v912_v29 = vpack.c.bf16 %v849_v28, %v848_v27 }
 0x119   : > { %1086 = vmatmul.bf16.gmra.mxu2 %v912_v29 }
 0x11a   : > { %v635_v30 = vpop.f32.mrf.mxu0  ;;  %v684_v31 = vpop.f32.mrf.mxu1 }
 0x11b   : > { %v685_v33 = vadd.f32 %v684_v31, %v635_v30 }
 0x11d   : > { %v850_v39 = vmul.f32 %v829_v38, %v685_v33  ;;  %v1131_v27 = vpop.f32.mrf.mxu3 }
 0x122   : > { %v637_v34 = vpop.f32.mrf.mxu0  ;;  %v686_v35 = vpop.f32.mrf.mxu1 }
 0x123   : > { %v687_v36 = vadd.f32 %v686_v35, %v637_v34 }
 0x125   : > { %v851_v40 = vmul.f32 %v834_v37, %v687_v36  ;;  %v1133_v35 = vpop.f32.mrf.mxu3 }
 0x127   : > { %v914_v41 = vpack.c.bf16 %v851_v40, %v850_v39 }
 0x129   : > { %1091 = vmatmul.bf16.gmra.mxu2 %v914_v41 }
 0x12d   : > { %v1136_v41 = vpop.f32.mrf.mxu3 }
 0x13c   : > { %v1057_v44 = vpop.f32.mrf.mxu2 }
 0x13d   : > { %v1058_v47 = vadd.f32 %v1800_v45, %v1057_v44 }
 0x13f   : > { %v1107_v49 = vadd.f32 %v1106_v32, %v1058_v47 }
 0x141   : > { %v1146_v53 = vmax.f32 %v1107_v49, 0.0 }
 0x144   : > { %v1059_v48 = vpop.f32.mrf.mxu2 }
 0x145   : > { %v1060_v50 = vadd.f32 %v1800_v45, %v1059_v48  ;;  %v1138_v48 = vpop.f32.mrf.mxu3 }
 0x147   : > { %v1109_v51 = vadd.f32 %v1108_v42, %v1060_v50 }
 0x149   : > { %v1147_v54 = vmax.f32 %v1109_v51, 0.0 }
 0x14b   : > { %v1493_v55 = vpack.c.bf16 %v1147_v54, %v1146_v53 }
 0x14c   : > { %v1062_v56 = vpop.f32.mrf.mxu2 }
 0x14d   : > { %1494 = vst [vmem:[%s1808_s25] sm:$0xff] %v1493_v55   ;;  %v1063_v57 = vadd.f32 %v1800_v45, %v1062_v56  ;;  %v1141_v56 = vpop.f32.mrf.mxu3 }
 0x14f   : > { %v1112_v60 = vadd.f32 %v1111_v43, %v1063_v57 }
 0x151   : > { %v1148_v63 = vmax.f32 %v1112_v60, 0.0 }
 0x154   : > { %v1064_v59 = vpop.f32.mrf.mxu2 }
 0x155   : > { %v1065_v61 = vadd.f32 %v1800_v45, %v1064_v59 }
 0x157   : > { %v1114_v62 = vadd.f32 %v1113_v46, %v1065_v61 }
 0x159   : > { %v1149_v0 = vmax.f32 %v1114_v62, 0.0  ;;  %v1143_v62 = vpop.f32.mrf.mxu3 }
 0x15b   : > { %v1498_v1 = vpack.c.bf16 %v1149_v0, %v1148_v63 }
 0x15c   : > { %v1067_v2 = vpop.f32.mrf.mxu2 }
 0x15d   : > { %1537 = vst [vmem:[%s1808_s25 + $0x8] sm:$0xff] %v1498_v1   ;;  %v1068_v4 = vadd.f32 %v1800_v45, %v1067_v2 }
 0x15f   : > { %v1117_v6 = vadd.f32 %v1116_v52, %v1068_v4 }
 0x161   : > { %v1150_v10 = vmax.f32 %v1117_v6, 0.0 }
 0x164   : > { %v1069_v5 = vpop.f32.mrf.mxu2 }
 0x165   : > { %v1070_v7 = vadd.f32 %v1800_v45, %v1069_v5 }
 0x167   : > { %v1119_v9 = vadd.f32 %v1118_v58, %v1070_v7 }
 0x169   : > { %v1151_v11 = vmax.f32 %v1119_v9, 0.0 }
 0x16b   : > { %v1503_v12 = vpack.c.bf16 %v1151_v11, %v1150_v10 }
 0x16c   : > { %v1072_v13 = vpop.f32.mrf.mxu2 }
 0x16d   : > { %1538 = vst [vmem:[%s1808_s25 + $0x10] sm:$0xff] %v1503_v12   ;;  %v1073_v15 = vadd.f32 %v1800_v45, %v1072_v13 }
 0x16f   : > { %v1122_v17 = vadd.f32 %v1121_v3, %v1073_v15 }
 0x171   : > { %v1152_v20 = vmax.f32 %v1122_v17, 0.0 }
 0x174   : > { %v1074_v16 = vpop.f32.mrf.mxu2 }
 0x175   : > { %v1075_v18 = vadd.f32 %v1800_v45, %v1074_v16 }
 0x177   : > { %v1124_v19 = vadd.f32 %v1123_v8, %v1075_v18 }
 0x179   : > { %v1153_v21 = vmax.f32 %v1124_v19, 0.0 }
 0x17b   : > { %v1508_v23 = vpack.c.bf16 %v1153_v21, %v1152_v20 }
 0x17c   : > { %v1077_v24 = vpop.f32.mrf.mxu2 }
 0x17d   : > { %1539 = vst [vmem:[%s1808_s25 + $0x18] sm:$0xff] %v1508_v23   ;;  %v1078_v25 = vadd.f32 %v1800_v45, %v1077_v24 }
 0x17f   : > { %v1127_v28 = vadd.f32 %v1126_v14, %v1078_v25 }
 0x181   : > { %v1154_v31 = vmax.f32 %v1127_v28, 0.0 }
 0x184   : > { %v1079_v26 = vpop.f32.mrf.mxu2 }
 0x185   : > { %v1080_v29 = vadd.f32 %v1800_v45, %v1079_v26 }
 0x187   : > { %v1129_v30 = vadd.f32 %v1128_v22, %v1080_v29 }
 0x189   : > { %v1155_v32 = vmax.f32 %v1129_v30, 0.0 }
 0x18b   : > { %v1513_v33 = vpack.c.bf16 %v1155_v32, %v1154_v31 }
 0x18c   : > { %v1082_v34 = vpop.f32.mrf.mxu2 }
 0x18d   : > { %1540 = vst [vmem:[%s1808_s25 + $0x20] sm:$0xff] %v1513_v33   ;;  %v1083_v36 = vadd.f32 %v1800_v45, %v1082_v34 }
 0x18f   : > { %v1132_v38 = vadd.f32 %v1131_v27, %v1083_v36 }
 0x191   : > { %v1156_v42 = vmax.f32 %v1132_v38, 0.0 }
 0x194   : > { %v1084_v37 = vpop.f32.mrf.mxu2 }
 0x195   : > { %v1085_v39 = vadd.f32 %v1800_v45, %v1084_v37 }
 0x197   : > { %v1134_v40 = vadd.f32 %v1133_v35, %v1085_v39 }
 0x199   : > { %v1157_v43 = vmax.f32 %v1134_v40, 0.0 }
 0x19b   : > { %v1518_v44 = vpack.c.bf16 %v1157_v43, %v1156_v42 }
 0x19c   : > { %v1087_v46 = vpop.f32.mrf.mxu2 }
 0x19d   : > { %1541 = vst [vmem:[%s1808_s25 + $0x28] sm:$0xff] %v1518_v44   ;;  %v1088_v47 = vadd.f32 %v1800_v45, %v1087_v46 }
 0x19f   : > { %v1137_v50 = vadd.f32 %v1136_v41, %v1088_v47 }
 0x1a1   : > { %v1158_v53 = vmax.f32 %v1137_v50, 0.0 }
 0x1a4   : > { %v1089_v49 = vpop.f32.mrf.mxu2 }
 0x1a5   : > { %v1090_v51 = vadd.f32 %v1800_v45, %v1089_v49 }
 0x1a7   : > { %v1139_v52 = vadd.f32 %v1138_v48, %v1090_v51 }
 0x1a9   : > { %v1159_v54 = vmax.f32 %v1139_v52, 0.0 }
 0x1ab   : > { %v1523_v55 = vpack.c.bf16 %v1159_v54, %v1158_v53 }
 0x1ac   : > { %v1092_v57 = vpop.f32.mrf.mxu2 }
 0x1ad   : > { %1542 = vst [vmem:[%s1808_s25 + $0x30] sm:$0xff] %v1523_v55   ;;  %v1093_v58 = vadd.f32 %v1800_v45, %v1092_v57 }
 0x1af   : > { %v1142_v60 = vadd.f32 %v1141_v56, %v1093_v58 }
 0x1b1   : > { %v1160_v0 = vmax.f32 %v1142_v60, 0.0 }
 0x1b4   : > { %v1094_v59 = vpop.f32.mrf.mxu2 }
 0x1b5   : > { %v1095_v61 = vadd.f32 %v1800_v45, %v1094_v59 }
 0x1b7   : > { %v1144_v63 = vadd.f32 %v1143_v62, %v1095_v61 }
 0x1b9   : > { %v1161_v1 = vmax.f32 %v1144_v63, 0.0 }
 0x1bb   : > { %v1528_v2 = vpack.c.bf16 %v1161_v1, %v1160_v0 }
 0x1bd   : > { %1543 = vst [vmem:[%s1808_s25 + $0x38] sm:$0xff] %v1528_v2  }
 0x1be PF: > { %s15_s20 = sadd.s32 1, %s1595_s20   ;;  %s1847_s18 = smov %s1591_s19 }
 0x1bf   : > { %p12_p6 = scmp.ge.s32.totalorder %s15_s20, 4   ;;  %s1848_s19 = smov %s1850_s21 }
 0x1c1   :  { %14 = sbr.rel (!%p12_p6) target bundleno = 2 (0x2), region = 83 }

// kernel: sage_forward.3
= control target key start
LH: loop header
LB: loop body
LE: loop exit
PB: predicated region body
PF: predicated region fallthrough
CT: control target
= control target key end

     0   :  { %s1739_s24 = smov 0   ;;  %s1741_s25 = smov 0   ;;  %s2014_s0 = inlined_call_operand.vmem [shape: s8[256,256], index: 0, kind: input, shape index: {}]   ;;  %s2015_s1 = inlined_call_operand.vmem [shape: bf16[256,128], index: 1, kind: input, shape index: {}]   ;;  %s2016_s2 = inlined_call_operand.vmem [shape: f32[256,1], index: 2, kind: input, shape index: {}]   ;;  %s2017_s3 = inlined_call_operand.vmem [shape: bf16[256,128], index: 3, kind: input, shape index: {}]   ;;  %s2018_s4 = inlined_call_operand.vmem [shape: f32[1,128], index: 4, kind: input, shape index: {}]   ;;  %s2019_s5 = inlined_call_operand.vmem [shape: f32[128,128], index: 5, kind: input, shape index: {}]   ;;  %s2020_s6 = inlined_call_operand.vmem [shape: f32[1,128], index: 6, kind: input, shape index: {}]   ;;  %s2021_s7 = inlined_call_operand.vmem [shape: f32[256,128], index: 7, kind: output, shape index: {}]  }
   0x1   :  { %s1743_s26 = smov 0  }
   0x2 LB: > { %s29_s27 = sadd.s32 1, %s1692_s25  ;;  %p1408_p0 = scmp.ge.s32.totalorder %s1696_s26, 1  ;;  %s1696_s26 = sphi %s1743_s26, %s17_s26   ;;  %s1692_s25 = sphi %s1741_s25, %s2023_s25   ;;  %s1688_s24 = sphi %s1739_s24, %s2022_s24  }
   0x3   : > { %p31_p1 = scmp.ge.s32.totalorder %s29_s27, 2  ;;  %p269_p2 = scmp.lt.s32.totalorder %s1696_s26, 3 }
   0x5   : > { %s2025_s27 = smov (%p31_p1, %s29_s27), 0  ;;  %p270_p3 = pnand %p1408_p0, %p269_p2 }
   0x6   : > { %s1409_s30 = sshll.u32 (!%p270_p3), %s1688_s24, 2  ;;  %s1412_s8 = sshll.u32 (!%p270_p3), %s1688_s24, 4 }
   0x7   : > { %273 = sbr.rel (%p270_p3) target bundleno = 603 (0x25b), region = 48  ;;  %p324_p4 = scmp.lt.s32.totalorder (!%p270_p3), %s1412_s8, 31 }
   0x8   : > { %p313_p5 = scmp.lt.s32.totalorder (!%p270_p3), %s1409_s30, 7  ;;  %s1416_s20 = sshll.u32 (!%p270_p3), %s1688_s24, 7 }
   0x9   : > { %s356_s21 = sshra.s32 (!%p270_p3), %s1416_s20, 3 }
   0xa   : > { %s1417_s9 = sshll.u32 (!%p270_p3), %s356_s21, 2 }
   0xb   : > { %s1897_s15 = scalar_lea.vmem (!%p270_p3), %s2015_s1, %s1417_s9 }
   0xc   : > { %v1556_v0 = vld [vmem:[%s2015_s1 + $0x38] sm:$0xff]  ;;  %v1555_v1 = vld [vmem:[%s2015_s1 + $0x30] sm:$0xff]  ;;  %v1698_v2 = vmov 0   ;;  %s2027_s8 = smov (!%p324_p4, %s1412_s8), 31  ;;  %v1554_v3 = vld [vmem:[%s2015_s1 + $0x28] sm:$0xff]  ;;  %s2029_s30 = smov (!%p313_p5, %s1409_s30), 7 }
   0xd   : > { %1620 = vmatpush.bf16.msra.mxu1 %v1556_v0  ;;  %645 = vmatpush.bf16.msra.mxu0 %v1556_v0  ;;  %s1413_s13 = sshll.u32 %s2027_s8, 3  ;;  %v1553_v5 = vld [vmem:[%s2015_s1 + $0x20] sm:$0xff]  ;;  %s1548_s19 = sshll.u32 %s2029_s30, 4  ;;  %v1552_v6 = vld [vmem:[%s2015_s1 + $0x18] sm:$0xff]  ;;  %v1551_v8 = vld [vmem:[%s2015_s1 + $0x10] sm:$0xff] }
   0xe   : > { %1669 = vset.pattern.permute.xlu0 %v1698_v2  ;;  %1670 = vset.pattern.permute.xlu1 %v1698_v2  ;;  %s1778_s16 = scalar_lea.vmem %s2016_s2, %s1413_s13  ;;  %s1791_s28 = scalar_lea.vmem %s2014_s0, %s1548_s19  ;;  %v1550_v15 = vld [vmem:[%s2015_s1 + $0x8] sm:$0xff]  ;;  %v1549_v21 = vld [vmem:[%s2015_s1] sm:$0xff]  ;;  %v1564_v22 = vld [vmem:[%s2015_s1 + $0x78] sm:$0xff] }
   0xf   : > { %1621 = vmatpush.bf16.msra.mxu2 %v1556_v0  ;;  %1671 = vset.pattern.permute.xlu2 %v1698_v2  ;;  %v794_v4 = vld [vmem:[%s1778_s16] sm:$0xff]  ;;  %v795_v7 = vld [vmem:[%s1778_s16 + $0x8] sm:$0xff]  ;;  %v411_v9 = vld [vmem:[%s1791_s28 + $0x10] sm:$0xff]  ;;  %s1987_s20 = scalar_lea.vmem %s2021_s7, %s1413_s13 }
  0x10   : > { %1622 = vmatpush.bf16.msra.mxu3 %v1556_v0  ;;  %812 = vperm.xlu0 %1669, %v794_v4   ;;  %v409_v10 = vld [vmem:[%s1791_s28] sm:$0xff]  ;;  %v425_v11 = vunpack.c.0.s8 %v411_v9  ;;  %v427_v12 = vunpack.c.1.s8 %v411_v9  ;;  %v800_v16 = vld [vmem:[%s1778_s16 + $0x30] sm:$0xff]  ;;  %v803_v27 = vld [vmem:[%s1778_s16 + $0x48] sm:$0xff]  ;;  %v429_v30 = vunpack.c.2.s8 %v411_v9  ;;  %v431_v31 = vunpack.c.3.s8 %v411_v9 }
  0x11   : > { %1623 = vmatpush.bf16.msra.mxu1 %v1555_v1  ;;  %646 = vmatpush.bf16.msra.mxu0 %v1555_v1  ;;  %v417_v13 = vunpack.c.0.s8 %v409_v10  ;;  %v419_v14 = vunpack.c.1.s8 %v409_v10  ;;  %v796_v23 = vld [vmem:[%s1778_s16 + $0x10] sm:$0xff]  ;;  %v797_v28 = vld [vmem:[%s1778_s16 + $0x18] sm:$0xff]  ;;  %v1562_v29 = vld [vmem:[%s2015_s1 + $0x68] sm:$0xff]  ;;  %v421_v32 = vunpack.c.2.s8 %v409_v10  ;;  %v423_v33 = vunpack.c.3.s8 %v409_v10 }
  0x12   : > { %v457_v17 = vcvt.s32.f32 %v425_v11  ;;  %v459_v18 = vcvt.s32.f32 %v427_v12  ;;  %822 = vperm.xlu1 %1670, %v796_v23   ;;  %v1563_v26 = vld [vmem:[%s2015_s1 + $0x70] sm:$0xff]  ;;  %v1561_v34 = vld [vmem:[%s2015_s1 + $0x60] sm:$0xff]  ;;  %v461_v36 = vcvt.s32.f32 %v429_v30  ;;  %v463_v37 = vcvt.s32.f32 %v431_v31  ;;  %v801_v40 = vld [vmem:[%s1778_s16 + $0x38] sm:$0xff] }
  0x13   : > { %1624 = vmatpush.bf16.msra.mxu2 %v1555_v1  ;;  %v449_v19 = vcvt.s32.f32 %v417_v13  ;;  %v451_v20 = vcvt.s32.f32 %v419_v14  ;;  %v806_v35 = vld [vmem:[%s1778_s16 + $0x60] sm:$0xff]  ;;  %v453_v38 = vcvt.s32.f32 %v421_v32  ;;  %v455_v39 = vcvt.s32.f32 %v423_v33  ;;  %v1560_v41 = vld [vmem:[%s2015_s1 + $0x58] sm:$0xff]  ;;  %v1559_v44 = vld [vmem:[%s2015_s1 + $0x50] sm:$0xff] }
  0x14   : > { %1625 = vmatpush.bf16.msra.mxu3 %v1555_v1  ;;  %v485_v24 = vpack.c.bf16 %v459_v18, %v457_v17  ;;  %v487_v42 = vpack.c.bf16 %v463_v37, %v461_v36  ;;  %v809_v45 = vld [vmem:[%s1778_s16 + $0x78] sm:$0xff]  ;;  %v804_v46 = vld [vmem:[%s1778_s16 + $0x50] sm:$0xff]  ;;  %v410_v47 = vld [vmem:[%s1791_s28 + $0x8] sm:$0xff] }
  0x15   : > { %1626 = vmatpush.bf16.msra.mxu1 %v1554_v3  ;;  %647 = vmatpush.bf16.msra.mxu0 %v1554_v3  ;;  %v481_v25 = vpack.c.bf16 %v451_v20, %v449_v19  ;;  %v483_v43 = vpack.c.bf16 %v455_v39, %v453_v38  ;;  %v1558_v48 = vld [vmem:[%s2015_s1 + $0x48] sm:$0xff]  ;;  %v418_v49 = vunpack.c.0.s8 %v410_v47  ;;  %v420_v50 = vunpack.c.1.s8 %v410_v47  ;;  %v1557_v51 = vld [vmem:[%s2015_s1 + $0x40] sm:$0xff]  ;;  %v805_v9 = vld [vmem:[%s1778_s16 + $0x58] sm:$0xff] }
  0x16   : > { %v807_v54 = vld [vmem:[%s1778_s16 + $0x68] sm:$0xff]  ;;  %v798_v56 = vld [vmem:[%s1778_s16 + $0x20] sm:$0xff]  ;;  %v422_v57 = vunpack.c.2.s8 %v410_v47  ;;  %v424_v58 = vunpack.c.3.s8 %v410_v47  ;;  %v808_v18 = vld [vmem:[%s1778_s16 + $0x70] sm:$0xff] }
  0x17   : > { %1627 = vmatpush.bf16.msra.mxu2 %v1554_v3  ;;  %v450_v52 = vcvt.s32.f32 %v418_v49  ;;  %v452_v53 = vcvt.s32.f32 %v420_v50  ;;  %832 = vperm.xlu2 %1671, %v798_v56   ;;  %v799_v59 = vld [vmem:[%s1778_s16 + $0x28] sm:$0xff]  ;;  %v413_v62 = vld [vmem:[%s1791_s28 + $0x20] sm:$0xff]  ;;  %v415_v23 = vld [vmem:[%s1791_s28 + $0x30] sm:$0xff] }
  0x18   : > { %1628 = vmatpush.bf16.msra.mxu3 %v1554_v3  ;;  %817 = vperm.xlu0 %1669, %v795_v7   ;;  %v454_v60 = vcvt.s32.f32 %v422_v57  ;;  %v456_v61 = vcvt.s32.f32 %v424_v58  ;;  %v433_v0 = vunpack.c.0.s8 %v413_v62  ;;  %v435_v1 = vunpack.c.1.s8 %v413_v62  ;;  %v414_v30 = vld [vmem:[%s1791_s28 + $0x28] sm:$0xff]  ;;  %v1571_v50 = vld [vmem:[%s2017_s3 + $0x30] sm:$0xff]  ;;  %v1576_v56 = vld [vmem:[%s2017_s3 + $0x58] sm:$0xff] }
  0x19   : > { %1629 = vmatpush.bf16.msra.mxu1 %v1553_v5  ;;  %648 = vmatpush.bf16.msra.mxu0 %v1553_v5  ;;  %v482_v55 = vpack.c.bf16 %v452_v53, %v450_v52  ;;  %v437_v13 = vunpack.c.2.s8 %v413_v62  ;;  %v439_v14 = vunpack.c.3.s8 %v413_v62  ;;  %v434_v31 = vunpack.c.0.s8 %v414_v30  ;;  %v1578_v49 = vld [vmem:[%s2017_s3 + $0x68] sm:$0xff]  ;;  %v416_v52 = vld [vmem:[%s1791_s28 + $0x38] sm:$0xff]  ;;  %v1569_v57 = vld [vmem:[%s2017_s3 + $0x20] sm:$0xff] }
  0x1a   : > { %827 = vperm.xlu1 %1670, %v797_v28   ;;  %v484_v63 = vpack.c.bf16 %v456_v61, %v454_v60  ;;  %v465_v2 = vcvt.s32.f32 %v433_v0  ;;  %v467_v3 = vcvt.s32.f32 %v435_v1  ;;  %v436_v32 = vunpack.c.1.s8 %v414_v30  ;;  %v1570_v53 = vld [vmem:[%s2017_s3 + $0x28] sm:$0xff]  ;;  %v1575_v58 = vld [vmem:[%s2017_s3 + $0x50] sm:$0xff]  ;;  %v1568_v61 = vld [vmem:[%s2017_s3 + $0x18] sm:$0xff] }
  0x1b   : > { %1630 = vmatpush.bf16.msra.mxu2 %v1553_v5  ;;  %v466_v33 = vcvt.s32.f32 %v434_v31  ;;  %v445_v36 = vunpack.c.2.s8 %v415_v23  ;;  %v447_v37 = vunpack.c.3.s8 %v415_v23  ;;  %v1574_v0 = vld [vmem:[%s2017_s3 + $0x48] sm:$0xff]  ;;  %v1567_v1 = vld [vmem:[%s2017_s3 + $0x10] sm:$0xff] }
  0x1c   : > { %1631 = vmatpush.bf16.msra.mxu3 %v1553_v5  ;;  %v489_v4 = vpack.c.bf16 %v467_v3, %v465_v2  ;;  %v802_v5 = vld [vmem:[%s1778_s16 + $0x40] sm:$0xff]  ;;  %v1566_v3 = vld [vmem:[%s2017_s3 + $0x8] sm:$0xff] }
  0x1d   : > { %1632 = vmatpush.bf16.msra.mxu1 %v1552_v6  ;;  %649 = vmatpush.bf16.msra.mxu0 %v1552_v6  ;;  %v477_v38 = vcvt.s32.f32 %v445_v36  ;;  %v479_v39 = vcvt.s32.f32 %v447_v37  ;;  %v1573_v2 = vld [vmem:[%s2017_s3 + $0x40] sm:$0xff] }
  0x1f   : > { %1633 = vmatpush.bf16.msra.mxu2 %v1552_v6  ;;  %837 = vperm.xlu2 %1671, %v799_v59  }
  0x20   : > { %1634 = vmatpush.bf16.msra.mxu3 %v1552_v6  ;;  %842 = vperm.xlu0 %1669, %v800_v16   ;;  %v412_v6 = vld [vmem:[%s1791_s28 + $0x18] sm:$0xff]  ;;  %v471_v16 = vcvt.s32.f32 %v439_v14  ;;  %v1613_v14 = vld [vmem:[%s1897_s15 + $0x8] sm:$0xff]  }
  0x21   : > { %1635 = vmatpush.bf16.msra.mxu1 %v1551_v8  ;;  %650 = vmatpush.bf16.msra.mxu0 %v1551_v8  ;;  %v426_v7 = vunpack.c.0.s8 %v412_v6  ;;  %v430_v19 = vunpack.c.2.s8 %v412_v6  ;;  %v432_v20 = vunpack.c.3.s8 %v412_v6 }
  0x22   : > { %847 = vperm.xlu1 %1670, %v801_v40   ;;  %v495_v40 = vpack.c.bf16 %v479_v39, %v477_v38 }
  0x23   : > { %1636 = vmatpush.bf16.msra.mxu2 %v1551_v8  ;;  %v458_v10 = vcvt.s32.f32 %v426_v7  ;;  %v1582_v7 = vld [vmem:[%s1897_s15] sm:$0xff]  }
  0x24   : > { %1637 = vmatpush.bf16.msra.mxu3 %v1551_v8  ;;  %v428_v8 = vunpack.c.1.s8 %v412_v6 }
  0x25   : > { %1638 = vmatpush.bf16.msra.mxu1 %v1550_v15  ;;  %651 = vmatpush.bf16.msra.mxu0 %v1550_v15 }
  0x26   : > { %v460_v11 = vcvt.s32.f32 %v428_v8  ;;  %v1565_v8 = vld [vmem:[%s2017_s3] sm:$0xff] }
  0x27   : > { %1639 = vmatpush.bf16.msra.mxu2 %v1550_v15  ;;  %852 = vperm.xlu2 %1671, %v802_v5   ;;  %v448_v5 = vunpack.c.3.s8 %v416_v52 }
  0x28   : > { %1640 = vmatpush.bf16.msra.mxu3 %v1550_v15  ;;  %857 = vperm.xlu0 %1669, %v803_v27   ;;  %v486_v12 = vpack.c.bf16 %v460_v11, %v458_v10  ;;  %v469_v15 = vcvt.s32.f32 %v437_v13 }
  0x29   : > { %1641 = vmatpush.bf16.msra.mxu1 %v1549_v21  ;;  %652 = vmatpush.bf16.msra.mxu0 %v1549_v21  ;;  %v480_v10 = vcvt.s32.f32 %v448_v5 }
  0x2a   : > { %862 = vperm.xlu1 %1670, %v804_v46   ;;  %v491_v17 = vpack.c.bf16 %v471_v16, %v469_v15 }
  0x2b   : > { %1642 = vmatpush.bf16.msra.mxu2 %v1549_v21 }
  0x2c   : > { %663 = vmatmul.bf16.vlgmr.msra.gmra.mxu1 %v485_v24  ;;  %653 = vmatmul.bf16.vlgmr.msra.gmra.mxu0 %v481_v25  ;;  %v441_v25 = vunpack.c.0.s8 %v415_v23 }
  0x2d   : > { %694 = vmatpush.bf16.msrb.mxu1 %v1564_v22  ;;  %1643 = vmatpush.bf16.msra.mxu3 %v1549_v21  ;;  %v462_v21 = vcvt.s32.f32 %v430_v19  ;;  %v464_v22 = vcvt.s32.f32 %v432_v20 }
  0x2e   : > { %673 = vmatmul.bf16.vlgmr.msra.gmra.mxu2 %v489_v4  ;;  %v473_v27 = vcvt.s32.f32 %v441_v25  ;;  %v446_v4 = vunpack.c.2.s8 %v416_v52 }
  0x2f   : > { %867 = vperm.xlu2 %1671, %v805_v9   ;;  %v488_v24 = vpack.c.bf16 %v464_v22, %v462_v21  ;;  %v1614_v21 = vld [vmem:[%s1897_s15 + $0x10] sm:$0xff]  }
  0x30   : > { %872 = vperm.xlu0 %1669, %v806_v35   ;;  %v478_v9 = vcvt.s32.f32 %v446_v4 }
  0x31   : > { %695 = vmatpush.bf16.msrb.mxu1 %v1563_v26  ;;  %v443_v26 = vunpack.c.1.s8 %v415_v23 }
  0x32   : > { %877 = vperm.xlu1 %1670, %v807_v54   ;;  %v442_v54 = vunpack.c.0.s8 %v416_v52  ;;  %v496_v11 = vpack.c.bf16 %v480_v10, %v478_v9 }
  0x33   : > { %v475_v28 = vcvt.s32.f32 %v443_v26 }
  0x34   : > { %v474_v59 = vcvt.s32.f32 %v442_v54 }
  0x35   : > { %696 = vmatpush.bf16.msrb.mxu1 %v1562_v29  ;;  %v493_v29 = vpack.c.bf16 %v475_v28, %v473_v27 }
  0x37   : > { %882 = vperm.xlu2 %1671, %v808_v18   ;;  %683 = vmatmul.bf16.vlgmr.msra.gmra.mxu3 %v493_v29 }
  0x38   : > { %887 = vperm.xlu0 %1669, %v809_v45   ;;  %v1579_v45 = vld [vmem:[%s2017_s3 + $0x70] sm:$0xff] }
  0x39   : > { %697 = vmatpush.bf16.msrb.mxu1 %v1561_v34  ;;  %v468_v34 = vcvt.s32.f32 %v436_v32 }
  0x3b   : > { %v490_v35 = vpack.c.bf16 %v468_v34, %v466_v33  ;;  %v1615_v33 = vld [vmem:[%s1897_s15 + $0x18] sm:$0xff]  }
  0x3c   : > { %668 = vmatmul.bf16.gmra.mxu1 %v487_v42  ;;  %658 = vmatmul.bf16.gmra.mxu0 %v483_v43  ;;  %v440_v42 = vunpack.c.3.s8 %v414_v30  ;;  %v1580_v43 = vld [vmem:[%s2017_s3 + $0x78] sm:$0xff] }
  0x3d   : > { %698 = vmatpush.bf16.msrb.mxu1 %v1560_v41  ;;  %v438_v41 = vunpack.c.2.s8 %v414_v30  ;;  %1151 = vmatpush.bf16.msrb.mxu3 %v1580_v43  ;;  %v1616_v43 = vld [vmem:[%s1897_s15 + $0x20] sm:$0xff]  }
  0x3e   : > { %678 = vmatmul.bf16.gmra.mxu2 %v491_v17  ;;  %v472_v47 = vcvt.s32.f32 %v440_v42 }
  0x3f   : > { %v470_v46 = vcvt.s32.f32 %v438_v41 }
  0x41   : > { %699 = vmatpush.bf16.msrb.mxu1 %v1559_v44  ;;  %v1572_v44 = vld [vmem:[%s2017_s3 + $0x38] sm:$0xff]  ;;  %1152 = vmatpush.bf16.msrb.mxu3 %v1579_v45 }
  0x42   : > { %1102 = vmatpush.bf16.msrb.mxu2 %v1572_v44 }
  0x45   : > { %700 = vmatpush.bf16.msrb.mxu1 %v1558_v48  ;;  %v492_v48 = vpack.c.bf16 %v472_v47, %v470_v46  ;;  %1153 = vmatpush.bf16.msrb.mxu3 %v1578_v49 }
  0x46   : > { %1103 = vmatpush.bf16.msrb.mxu2 %v1571_v50 }
  0x47   : > { %688 = vmatmul.bf16.gmra.mxu3 %v495_v40 }
  0x49   : > { %701 = vmatpush.bf16.msrb.mxu1 %v1557_v51  ;;  %v1577_v51 = vld [vmem:[%s2017_s3 + $0x60] sm:$0xff] }
  0x4a   : > { %1154 = vmatpush.bf16.msrb.mxu3 %v1577_v51  ;;  %1104 = vmatpush.bf16.msrb.mxu2 %v1570_v53 }
  0x4c   : > { %702 = vmatmul.bf16.vlgmr.msrb.gmra.mxu1 %v482_v55  ;;  %v444_v55 = vunpack.c.1.s8 %v416_v52  ;;  %v1617_v52 = vld [vmem:[%s1897_s15 + $0x28] sm:$0xff]  }
  0x4e   : > { %1155 = vmatpush.bf16.msrb.mxu3 %v1576_v56  ;;  %v476_v60 = vcvt.s32.f32 %v444_v55  ;;  %1105 = vmatpush.bf16.msrb.mxu2 %v1569_v57 }
  0x50   : > { %v494_v62 = vpack.c.bf16 %v476_v60, %v474_v59 }
  0x52   : > { %1156 = vmatpush.bf16.msrb.mxu3 %v1575_v58  ;;  %1106 = vmatpush.bf16.msrb.mxu2 %v1568_v61 }
  0x56   : > { %1157 = vmatpush.bf16.msrb.mxu3 %v1574_v0  ;;  %1107 = vmatpush.bf16.msrb.mxu2 %v1567_v1  ;;  %v1618_v0 = vld [vmem:[%s1897_s15 + $0x30] sm:$0xff]  }
  0x5a   : > { %1158 = vmatpush.bf16.msrb.mxu3 %v1573_v2  ;;  %1108 = vmatpush.bf16.msrb.mxu2 %v1566_v3 }
  0x5c   : > { %707 = vmatmul.bf16.gmra.mxu1 %v484_v63 }
  0x5d   : > { %1159 = vmatmul.bf16.vlgmr.msrb.gmra.mxu3 %v1582_v7 }
  0x5e   : > { %1109 = vmatpush.bf16.msrb.mxu2 %v1565_v8 }
  0x6c   : > { %712 = vmatmul.bf16.gmra.mxu1 %v486_v12 }
  0x6d   : > { %1164 = vmatmul.bf16.gmra.mxu3 %v1613_v14 }
  0x71   : > { %v833_v39 = vpop.permute.xlu2 %832 }
  0x79   : > { %v838_v45 = vpop.permute.xlu2 %837 }
  0x7c   : > { %717 = vmatmul.bf16.gmra.mxu1 %v488_v24 }
  0x7d   : > { %1169 = vmatmul.bf16.gmra.mxu3 %v1614_v21  ;;  %v1230_v21 = vld [vmem:[%s2019_s5 + $0x70] sm:$0xff] }
  0x81   : > { %v853_v3 = vpop.permute.xlu2 %852 }
  0x82   : > { %v813_v16 = vpop.permute.xlu0 %812 }
  0x84   : > { %v823_v28 = vpop.permute.xlu1 %822 }
  0x8a   : > { %v818_v23 = vpop.permute.xlu0 %817 }
  0x8c   : > { %722 = vmatmul.bf16.gmra.mxu1 %v490_v35  ;;  %v828_v35 = vpop.permute.xlu1 %827 }
  0x8d   : > { %1174 = vmatmul.bf16.gmra.mxu3 %v1615_v33 }
  0x92   : > { %v843_v53 = vpop.permute.xlu0 %842 }
  0x94   : > { %v848_v55 = vpop.permute.xlu1 %847 }
  0x9a   : > { %v858_v2 = vpop.permute.xlu0 %857 }
  0x9c   : > { %727 = vmatmul.bf16.gmra.mxu1 %v492_v48  ;;  %v863_v14 = vpop.permute.xlu1 %862 }
  0x9d   : > { %1179 = vmatmul.bf16.gmra.mxu3 %v1616_v43 }
  0xa9   : > { %v664_v63 = vpop.f32.mrf.mxu1  ;;  %v654_v15 = vpop.f32.mrf.mxu0 }
  0xac   : > { %732 = vmatmul.bf16.gmra.mxu1 %v494_v62 }
  0xad   : > { %1184 = vmatmul.bf16.gmra.mxu3 %v1617_v52 }
  0xb1   : > { %v666_v6 = vpop.f32.mrf.mxu1  ;;  %v656_v18 = vpop.f32.mrf.mxu0 }
  0xb2   : > { %v674_v56 = vpop.f32.mrf.mxu2 }
  0xb9   : > { %v669_v12 = vpop.f32.mrf.mxu1  ;;  %v659_v27 = vpop.f32.mrf.mxu0 }
  0xba   : > { %v676_v61 = vpop.f32.mrf.mxu2  ;;  %v684_v9 = vpop.f32.mrf.mxu3 }
  0xbc   : > { %737 = vmatmul.bf16.gmra.mxu1 %v496_v11 }
  0xbd   : > { %1189 = vmatmul.bf16.gmra.mxu3 %v1618_v0 }
  0xc1   : > { %v671_v13 = vpop.f32.mrf.mxu1  ;;  %v661_v31 = vpop.f32.mrf.mxu0 }
  0xc2   : > { %v679_v7 = vpop.f32.mrf.mxu2 }
  0xc9   : > { %v703_v17 = vpop.f32.mrf.mxu1 }
  0xca   : > { %v704_v19 = vadd.f32 %v703_v17, %v654_v15  ;;  %v681_v11 = vpop.f32.mrf.mxu2  ;;  %v868_v17 = vpop.permute.xlu2 %867 }
  0xcc   : > { %v890_v24 = vmul.f32 %v813_v16, %v704_v19  ;;  %v1231_v16 = vld [vmem:[%s2019_s5 + $0x78] sm:$0xff] }
  0xcd   : > { %1236 = vmatpush.msrb.mxu0 %v1231_v16 }
  0xcf   : > { %1237 = vmatpush.msrb.mxu0 %v1230_v21 }
  0xd1   : > { %v705_v20 = vpop.f32.mrf.mxu1 }
  0xd2   : > { %v706_v22 = vadd.f32 %v705_v20, %v656_v18  ;;  %v686_v18 = vpop.f32.mrf.mxu3 }
  0xd4   : > { %v891_v25 = vmul.f32 %v818_v23, %v706_v22  ;;  %v1229_v22 = vld [vmem:[%s2019_s5 + $0x68] sm:$0xff] }
  0xd5   : > { %1238 = vmatpush.msrb.mxu0 %v1229_v22 }
  0xd6   : > { %v954_v26 = vpack.c.bf16 %v891_v25, %v890_v24  ;;  %v1228_v24 = vld [vmem:[%s2019_s5 + $0x60] sm:$0xff]  ;;  %v1227_v25 = vld [vmem:[%s2019_s5 + $0x58] sm:$0xff] }
  0xd7   : > { %1239 = vmatpush.msrb.mxu0 %v1228_v24 }
  0xd8   : > { %1110 = vmatmul.bf16.vlgmr.msrb.gmra.mxu2 %v954_v26 }
  0xd9   : > { %v708_v29 = vpop.f32.mrf.mxu1  ;;  %1240 = vmatpush.msrb.mxu0 %v1227_v25 }
  0xda   : > { %v709_v30 = vadd.f32 %v708_v29, %v659_v27  ;;  %v1226_v27 = vld [vmem:[%s2019_s5 + $0x50] sm:$0xff]  ;;  %v689_v29 = vpop.f32.mrf.mxu3 }
  0xdb   : > { %1241 = vmatpush.msrb.mxu0 %v1226_v27 }
  0xdc   : > { %v892_v36 = vmul.f32 %v823_v28, %v709_v30  ;;  %v1225_v28 = vld [vmem:[%s2019_s5 + $0x48] sm:$0xff]  ;;  %v1224_v30 = vld [vmem:[%s2019_s5 + $0x40] sm:$0xff] }
  0xdd   : > { %1242 = vmatpush.msrb.mxu0 %v1225_v28 }
  0xdf   : > { %1243 = vmatpush.msrb.mxu0 %v1224_v30 }
  0xe1   : > { %v710_v32 = vpop.f32.mrf.mxu1 }
  0xe2   : > { %v711_v34 = vadd.f32 %v710_v32, %v661_v31  ;;  %v1223_v32 = vld [vmem:[%s2019_s5 + $0x38] sm:$0xff]  ;;  %v691_v43 = vpop.f32.mrf.mxu3 }
  0xe3   : > { %1244 = vmatpush.msrb.mxu0 %v1223_v32 }
  0xe4   : > { %v893_v37 = vmul.f32 %v828_v35, %v711_v34  ;;  %v1222_v35 = vld [vmem:[%s2019_s5 + $0x30] sm:$0xff] }
  0xe5   : > { %1245 = vmatpush.msrb.mxu0 %v1222_v35 }
  0xe6   : > { %v956_v38 = vpack.c.bf16 %v893_v37, %v892_v36  ;;  %v873_v36 = vpop.permute.xlu0 %872  ;;  %v878_v37 = vpop.permute.xlu1 %877 }
  0xe8   : > { %1115 = vmatmul.bf16.gmra.mxu2 %v956_v38 }
  0xe9   : > { %v713_v40 = vpop.f32.mrf.mxu1 }
  0xea   : > { %v714_v41 = vadd.f32 %v713_v40, %v664_v63  ;;  %v1221_v40 = vld [vmem:[%s2019_s5 + $0x28] sm:$0xff] }
  0xeb   : > { %1246 = vmatpush.msrb.mxu0 %v1221_v40 }
  0xec   : > { %v894_v46 = vmul.f32 %v833_v39, %v714_v41 }
  0xf1   : > { %v715_v42 = vpop.f32.mrf.mxu1 }
  0xf2   : > { %v716_v44 = vadd.f32 %v715_v42, %v666_v6  ;;  %v1220_v42 = vld [vmem:[%s2019_s5 + $0x20] sm:$0xff] }
  0xf3   : > { %1247 = vmatpush.msrb.mxu0 %v1220_v42 }
  0xf4   : > { %v895_v47 = vmul.f32 %v838_v45, %v716_v44  ;;  %v1219_v44 = vld [vmem:[%s2019_s5 + $0x18] sm:$0xff] }
  0xf5   : > { %1248 = vmatpush.msrb.mxu0 %v1219_v44 }
  0xf6   : > { %v958_v48 = vpack.c.bf16 %v895_v47, %v894_v46  ;;  %v1218_v46 = vld [vmem:[%s2019_s5 + $0x10] sm:$0xff]  ;;  %v1217_v47 = vld [vmem:[%s2019_s5 + $0x8] sm:$0xff] }
  0xf7   : > { %1249 = vmatpush.msrb.mxu0 %v1218_v46 }
  0xf8   : > { %1120 = vmatmul.bf16.gmra.mxu2 %v958_v48  ;;  %v1160_v48 = vpop.f32.mrf.mxu3 }
  0xf9   : > { %v718_v49 = vpop.f32.mrf.mxu1  ;;  %1250 = vmatpush.msrb.mxu0 %v1217_v47 }
  0xfa   : > { %v719_v50 = vadd.f32 %v718_v49, %v669_v12 }
  0xfc   : > { %v896_v57 = vmul.f32 %v843_v53, %v719_v50  ;;  %v1216_v50 = vld [vmem:[%s2019_s5] sm:$0xff]  ;;  %v888_v53 = vpop.permute.xlu0 %887 }
  0xfd   : > { %1251 = vmatpush.msrb.mxu0 %v1216_v50 }
 0x101   : > { %v720_v51 = vpop.f32.mrf.mxu1 }
 0x102   : > { %v721_v54 = vadd.f32 %v720_v51, %v671_v13  ;;  %v1619_v13 = vld [vmem:[%s1897_s15 + $0x38] sm:$0xff]  }
 0x103   : > { %1194 = vmatmul.bf16.gmra.mxu3 %v1619_v13 }
 0x104   : > { %v897_v58 = vmul.f32 %v848_v55, %v721_v54  ;;  %v883_v54 = vpop.permute.xlu2 %882 }
 0x106   : > { %v960_v59 = vpack.c.bf16 %v897_v58, %v896_v57  ;;  %v1162_v58 = vpop.f32.mrf.mxu3 }
 0x108   : > { %1125 = vmatmul.bf16.gmra.mxu2 %v960_v59 }
 0x109   : > { %v723_v60 = vpop.f32.mrf.mxu1 }
 0x10a   : > { %v724_v62 = vadd.f32 %v723_v60, %v674_v56  ;;  %v1961_v60 = vld [vmem:[%s2018_s4] ss:$0 sm:$0xff] }
 0x10c   : > { %v898_v4 = vmul.f32 %v853_v3, %v724_v62 }
 0x10e   : > { %v1165_v59 = vpop.f32.mrf.mxu3 }
 0x111   : > { %v725_v63 = vpop.f32.mrf.mxu1 }
 0x112   : > { %v726_v1 = vadd.f32 %v725_v63, %v676_v61 }
 0x114   : > { %v899_v5 = vmul.f32 %v858_v2, %v726_v1 }
 0x116   : > { %v962_v6 = vpack.c.bf16 %v899_v5, %v898_v4  ;;  %v1167_v63 = vpop.f32.mrf.mxu3 }
 0x118   : > { %1130 = vmatmul.bf16.gmra.mxu2 %v962_v6 }
 0x119   : > { %v728_v8 = vpop.f32.mrf.mxu1 }
 0x11a   : > { %v729_v10 = vadd.f32 %v728_v8, %v679_v7 }
 0x11c   : > { %v900_v19 = vmul.f32 %v863_v14, %v729_v10 }
 0x11e   : > { %v1170_v5 = vpop.f32.mrf.mxu3 }
 0x121   : > { %v730_v12 = vpop.f32.mrf.mxu1 }
 0x122   : > { %v731_v15 = vadd.f32 %v730_v12, %v681_v11 }
 0x124   : > { %v901_v20 = vmul.f32 %v868_v17, %v731_v15 }
 0x126   : > { %v964_v23 = vpack.c.bf16 %v901_v20, %v900_v19  ;;  %v1172_v11 = vpop.f32.mrf.mxu3 }
 0x128   : > { %1135 = vmatmul.bf16.gmra.mxu2 %v964_v23 }
 0x129   : > { %v733_v26 = vpop.f32.mrf.mxu1 }
 0x12a   : > { %v734_v31 = vadd.f32 %v733_v26, %v684_v9 }
 0x12c   : > { %v902_v38 = vmul.f32 %v873_v36, %v734_v31 }
 0x12e   : > { %v1175_v17 = vpop.f32.mrf.mxu3 }
 0x131   : > { %v735_v33 = vpop.f32.mrf.mxu1 }
 0x132   : > { %v736_v34 = vadd.f32 %v735_v33, %v686_v18 }
 0x134   : > { %v903_v39 = vmul.f32 %v878_v37, %v736_v34 }
 0x136   : > { %v966_v41 = vpack.c.bf16 %v903_v39, %v902_v38  ;;  %v1177_v23 = vpop.f32.mrf.mxu3 }
 0x138   : > { %1140 = vmatmul.bf16.gmra.mxu2 %v966_v41 }
 0x139   : > { %v738_v45 = vpop.f32.mrf.mxu1 }
 0x13a   : > { %v739_v49 = vadd.f32 %v738_v45, %v689_v29 }
 0x13c   : > { %v904_v55 = vmul.f32 %v883_v54, %v739_v49 }
 0x13e   : > { %v1180_v29 = vpop.f32.mrf.mxu3 }
 0x141   : > { %v740_v51 = vpop.f32.mrf.mxu1 }
 0x142   : > { %v741_v52 = vadd.f32 %v740_v51, %v691_v43 }
 0x144   : > { %v905_v56 = vmul.f32 %v888_v53, %v741_v52 }
 0x146   : > { %v968_v57 = vpack.c.bf16 %v905_v56, %v904_v55  ;;  %v1182_v35 = vpop.f32.mrf.mxu3 }
 0x148   : > { %1145 = vmatmul.bf16.gmra.mxu2 %v968_v57 }
 0x14e   : > { %v1185_v41 = vpop.f32.mrf.mxu3 }
 0x156   : > { %v1187_v47 = vpop.f32.mrf.mxu3 }
 0x15b   : > { %v1111_v61 = vpop.f32.mrf.mxu2 }
 0x15c   : > { %v1112_v62 = vadd.f32 %v1961_v60, %v1111_v61 }
 0x15e   : > { %v1161_v0 = vadd.f32 %v1160_v48, %v1112_v62  ;;  %v1190_v53 = vpop.f32.mrf.mxu3 }
 0x160   : > { %v1200_v1 = vmax.f32 %v1161_v0, 0.0 }
 0x162   : > { %1252 = vmatmul.f32.vlgmr.msrb.gmra.mxu0 %v1200_v1 }
 0x163   : > { %v1113_v2 = vpop.f32.mrf.mxu2 }
 0x164   : > { %v1114_v3 = vadd.f32 %v1961_v60, %v1113_v2 }
 0x166   : > { %v1163_v4 = vadd.f32 %v1162_v58, %v1114_v3 }
 0x168   : > { %v1201_v6 = vmax.f32 %v1163_v4, 0.0 }
 0x16a   : > { %1255 = vmatmul.f32.gmra.mxu0 %v1201_v6 }
 0x16b   : > { %v1116_v7 = vpop.f32.mrf.mxu2 }
 0x16c   : > { %v1117_v8 = vadd.f32 %v1961_v60, %v1116_v7 }
 0x16e   : > { %v1166_v9 = vadd.f32 %v1165_v59, %v1117_v8  ;;  %v1192_v59 = vpop.f32.mrf.mxu3 }
 0x170   : > { %v1202_v10 = vmax.f32 %v1166_v9, 0.0 }
 0x172   : > { %1258 = vmatmul.f32.gmra.mxu0 %v1202_v10 }
 0x173   : > { %v1118_v12 = vpop.f32.mrf.mxu2 }
 0x174   : > { %v1119_v13 = vadd.f32 %v1961_v60, %v1118_v12 }
 0x176   : > { %v1168_v14 = vadd.f32 %v1167_v63, %v1119_v13 }
 0x178   : > { %v1203_v15 = vmax.f32 %v1168_v14, 0.0 }
 0x17a   : > { %1261 = vmatmul.f32.gmra.mxu0 %v1203_v15 }
 0x17b   : > { %v1121_v16 = vpop.f32.mrf.mxu2 }
 0x17c   : > { %v1122_v18 = vadd.f32 %v1961_v60, %v1121_v16 }
 0x17e   : > { %v1171_v19 = vadd.f32 %v1170_v5, %v1122_v18 }
 0x180   : > { %v1204_v20 = vmax.f32 %v1171_v19, 0.0 }
 0x182   : > { %1264 = vmatmul.f32.gmra.mxu0 %v1204_v20 }
 0x183   : > { %v1123_v21 = vpop.f32.mrf.mxu2 }
 0x184   : > { %v1124_v22 = vadd.f32 %v1961_v60, %v1123_v21 }
 0x186   : > { %v1173_v24 = vadd.f32 %v1172_v11, %v1124_v22  ;;  %v1195_v1 = vpop.f32.mrf.mxu3  ;;  %v1673_v11 = vld [vmem:[%s2020_s6] ss:$0 sm:$0xff] }
 0x188   : > { %v1205_v25 = vmax.f32 %v1173_v24, 0.0 }
 0x18a   : > { %1267 = vmatmul.f32.gmra.mxu0 %v1205_v25 }
 0x18b   : > { %v1126_v26 = vpop.f32.mrf.mxu2 }
 0x18c   : > { %v1127_v27 = vadd.f32 %v1961_v60, %v1126_v26 }
 0x18e   : > { %v1176_v28 = vadd.f32 %v1175_v17, %v1127_v27  ;;  %v1197_v8 = vpop.f32.mrf.mxu3 }
 0x190   : > { %v1206_v30 = vmax.f32 %v1176_v28, 0.0 }
 0x192   : > { %1270 = vmatmul.f32.gmra.mxu0 %v1206_v30 }
 0x193   : > { %v1128_v31 = vpop.f32.mrf.mxu2 }
 0x194   : > { %v1129_v32 = vadd.f32 %v1961_v60, %v1128_v31 }
 0x196   : > { %v1178_v33 = vadd.f32 %v1177_v23, %v1129_v32 }
 0x198   : > { %v1207_v34 = vmax.f32 %v1178_v33, 0.0 }
 0x19a   : > { %1273 = vmatmul.f32.gmra.mxu0 %v1207_v34 }
 0x19b   : > { %v1131_v36 = vpop.f32.mrf.mxu2 }
 0x19c   : > { %v1132_v37 = vadd.f32 %v1961_v60, %v1131_v36 }
 0x19e   : > { %v1181_v38 = vadd.f32 %v1180_v29, %v1132_v37 }
 0x1a0   : > { %v1208_v39 = vmax.f32 %v1181_v38, 0.0 }
 0x1a2   : > { %1276 = vmatmul.f32.gmra.mxu0 %v1208_v39 }
 0x1a3   : > { %v1133_v40 = vpop.f32.mrf.mxu2 }
 0x1a4   : > { %v1134_v42 = vadd.f32 %v1961_v60, %v1133_v40 }
 0x1a6   : > { %v1183_v43 = vadd.f32 %v1182_v35, %v1134_v42 }
 0x1a8   : > { %v1209_v44 = vmax.f32 %v1183_v43, 0.0 }
 0x1aa   : > { %1279 = vmatmul.f32.gmra.mxu0 %v1209_v44 }
 0x1ab   : > { %v1136_v45 = vpop.f32.mrf.mxu2 }
 0x1ac   : > { %v1137_v46 = vadd.f32 %v1961_v60, %v1136_v45 }
 0x1ae   : > { %v1186_v48 = vadd.f32 %v1185_v41, %v1137_v46 }
 0x1b0   : > { %v1210_v49 = vmax.f32 %v1186_v48, 0.0 }
 0x1b2   : > { %1282 = vmatmul.f32.gmra.mxu0 %v1210_v49 }
 0x1b3   : > { %v1138_v50 = vpop.f32.mrf.mxu2 }
 0x1b4   : > { %v1139_v51 = vadd.f32 %v1961_v60, %v1138_v50 }
 0x1b6   : > { %v1188_v52 = vadd.f32 %v1187_v47, %v1139_v51 }
 0x1b8   : > { %v1211_v54 = vmax.f32 %v1188_v52, 0.0 }
 0x1ba   : > { %1285 = vmatmul.f32.gmra.mxu0 %v1211_v54 }
 0x1bb   : > { %v1141_v55 = vpop.f32.mrf.mxu2 }
 0x1bc   : > { %v1142_v56 = vadd.f32 %v1961_v60, %v1141_v55 }
 0x1be   : > { %v1191_v57 = vadd.f32 %v1190_v53, %v1142_v56 }
 0x1c0   : > { %v1212_v58 = vmax.f32 %v1191_v57, 0.0 }
 0x1c2   : > { %1288 = vmatmul.f32.gmra.mxu0 %v1212_v58 }
 0x1c3   : > { %v1143_v61 = vpop.f32.mrf.mxu2 }
 0x1c4   : > { %v1144_v62 = vadd.f32 %v1961_v60, %v1143_v61 }
 0x1c6   : > { %v1193_v63 = vadd.f32 %v1192_v59, %v1144_v62 }
 0x1c8   : > { %v1213_v0 = vmax.f32 %v1193_v63, 0.0 }
 0x1ca   : > { %1291 = vmatmul.f32.gmra.mxu0 %v1213_v0 }
 0x1cb   : > { %v1146_v2 = vpop.f32.mrf.mxu2 }
 0x1cc   : > { %v1147_v3 = vadd.f32 %v1961_v60, %v1146_v2 }
 0x1ce   : > { %v1196_v4 = vadd.f32 %v1195_v1, %v1147_v3 }
 0x1d0   : > { %v1214_v5 = vmax.f32 %v1196_v4, 0.0 }
 0x1d2   : > { %1294 = vmatmul.f32.gmra.mxu0 %v1214_v5 }
 0x1d3   : > { %v1148_v6 = vpop.f32.mrf.mxu2 }
 0x1d4   : > { %v1149_v7 = vadd.f32 %v1961_v60, %v1148_v6 }
 0x1d6   : > { %v1198_v9 = vadd.f32 %v1197_v8, %v1149_v7 }
 0x1d8   : > { %v1215_v10 = vmax.f32 %v1198_v9, 0.0 }
 0x1da   : > { %1297 = vmatmul.f32.gmra.mxu0 %v1215_v10 }
 0x1df   : > { %v1253_v60 = vpop.f32.mrf.mxu0 }
 0x1e0   : > { %v1254_v12 = vadd.f32 %v1673_v11, %v1253_v60 }
 0x1e2   : > { %1301 = vst [vmem:[%s1987_s20] sm:$0xff] %v1254_v12 }
 0x1e7   : > { %v1256_v13 = vpop.f32.mrf.mxu0 }
 0x1e8   : > { %v1257_v14 = vadd.f32 %v1673_v11, %v1256_v13 }
 0x1ea   : > { %1302 = vst [vmem:[%s1987_s20 + $0x8] sm:$0xff] %v1257_v14 }
 0x1ef   : > { %v1259_v15 = vpop.f32.mrf.mxu0 }
 0x1f0   : > { %v1260_v16 = vadd.f32 %v1673_v11, %v1259_v15 }
 0x1f2   : > { %1303 = vst [vmem:[%s1987_s20 + $0x10] sm:$0xff] %v1260_v16 }
 0x1f7   : > { %v1262_v17 = vpop.f32.mrf.mxu0 }
 0x1f8   : > { %v1263_v18 = vadd.f32 %v1673_v11, %v1262_v17 }
 0x1fa   : > { %1304 = vst [vmem:[%s1987_s20 + $0x18] sm:$0xff] %v1263_v18 }
 0x1ff   : > { %v1265_v19 = vpop.f32.mrf.mxu0 }
 0x200   : > { %v1266_v20 = vadd.f32 %v1673_v11, %v1265_v19 }
 0x202   : > { %1305 = vst [vmem:[%s1987_s20 + $0x20] sm:$0xff] %v1266_v20 }
 0x207   : > { %v1268_v21 = vpop.f32.mrf.mxu0 }
 0x208   : > { %v1269_v22 = vadd.f32 %v1673_v11, %v1268_v21 }
 0x20a   : > { %1306 = vst [vmem:[%s1987_s20 + $0x28] sm:$0xff] %v1269_v22 }
 0x20f   : > { %v1271_v23 = vpop.f32.mrf.mxu0 }
 0x210   : > { %v1272_v24 = vadd.f32 %v1673_v11, %v1271_v23 }
 0x212   : > { %1307 = vst [vmem:[%s1987_s20 + $0x30] sm:$0xff] %v1272_v24 }
 0x217   : > { %v1274_v25 = vpop.f32.mrf.mxu0 }
 0x218   : > { %v1275_v26 = vadd.f32 %v1673_v11, %v1274_v25 }
 0x21a   : > { %1308 = vst [vmem:[%s1987_s20 + $0x38] sm:$0xff] %v1275_v26 }
 0x21f   : > { %v1277_v27 = vpop.f32.mrf.mxu0 }
 0x220   : > { %v1278_v28 = vadd.f32 %v1673_v11, %v1277_v27 }
 0x222   : > { %1309 = vst [vmem:[%s1987_s20 + $0x40] sm:$0xff] %v1278_v28 }
 0x227   : > { %v1280_v29 = vpop.f32.mrf.mxu0 }
 0x228   : > { %v1281_v30 = vadd.f32 %v1673_v11, %v1280_v29 }
 0x22a   : > { %1310 = vst [vmem:[%s1987_s20 + $0x48] sm:$0xff] %v1281_v30 }
 0x22f   : > { %v1283_v31 = vpop.f32.mrf.mxu0 }
 0x230   : > { %v1284_v32 = vadd.f32 %v1673_v11, %v1283_v31 }
 0x232   : > { %1311 = vst [vmem:[%s1987_s20 + $0x50] sm:$0xff] %v1284_v32 }
 0x237   : > { %v1286_v33 = vpop.f32.mrf.mxu0 }
 0x238   : > { %v1287_v34 = vadd.f32 %v1673_v11, %v1286_v33 }
 0x23a   : > { %1312 = vst [vmem:[%s1987_s20 + $0x58] sm:$0xff] %v1287_v34 }
 0x23f   : > { %v1289_v35 = vpop.f32.mrf.mxu0 }
 0x240   : > { %v1290_v36 = vadd.f32 %v1673_v11, %v1289_v35 }
 0x242   : > { %1313 = vst [vmem:[%s1987_s20 + $0x60] sm:$0xff] %v1290_v36 }
 0x247   : > { %v1292_v37 = vpop.f32.mrf.mxu0 }
 0x248   : > { %v1293_v38 = vadd.f32 %v1673_v11, %v1292_v37 }
 0x24a   : > { %1314 = vst [vmem:[%s1987_s20 + $0x68] sm:$0xff] %v1293_v38 }
 0x24f   : > { %v1295_v39 = vpop.f32.mrf.mxu0 }
 0x250   : > { %v1296_v40 = vadd.f32 %v1673_v11, %v1295_v39 }
 0x252   : > { %1315 = vst [vmem:[%s1987_s20 + $0x70] sm:$0xff] %v1296_v40 }
 0x257   : > { %v1298_v41 = vpop.f32.mrf.mxu0 }
 0x258   : > { %v1299_v42 = vadd.f32 %v1673_v11, %v1298_v41 }
 0x25a   : > { %1316 = vst [vmem:[%s1987_s20 + $0x78] sm:$0xff] %v1299_v42 }
 0x25b PF: > { %s17_s26 = sadd.s32 1, %s1696_s26   ;;  %s2022_s24 = smov %s1692_s25 }
 0x25c   : > { %p14_p6 = scmp.ge.s32.totalorder %s17_s26, 4   ;;  %s2023_s25 = smov %s2025_s27 }
 0x25e   :  { %16 = sbr.rel (!%p14_p6) target bundleno = 2 (0x2), region = 91 }

</bundles_post_ra>
